<compile_context>
chip_gen: v7x
topology: tpu7x:2x2x1
jax: 0.10.0
libtpu: 0.0.40
codegen_flags: <defaults>
</compile_context>

<pallas_src>
from itertools import combinations_with_replacement

import numpy as np
import jax
import jax.numpy as jnp
from jax.experimental import pallas as pl
from jax.experimental.pallas import tpu as pltpu

ITEM_NUM = 7
EMBED = 128
L1_DIM, L2_DIM, L3_DIM = 64, 128, 256
PAIRS = list(combinations_with_replacement(range(ITEM_NUM), 2))   # 28 pairs
NUM_PAIRS = len(PAIRS)                                            # 28
NUM_RELA = 4 * NUM_PAIRS                                          # 112
HIDDEN = 128                                                      # hidden_sizes=[128]
BN_EPS = 1e-5                                                     # BatchNorm1d default
NORM_EPS2 = 1e-24                                                 # F.normalize eps^2

# lane layout of the per-item feature slab / mask slab (all starts 128-aligned)
#   feat: [0,128)   l1: [128,192) (+zeros to 256)   l2: [256,384)   l3: [384,640)
SLAB_DIM = 640
_REL_SEGS = ((0, 128), (128, 128), (256, 128), (384, 256))   # feat, l1, l2, l3

_VMEM_LIMIT = 40 * 1024 * 1024        # raised above the 16/32 MiB scoped defaults
_STAGE1_BUDGET = 24 * 1024 * 1024     # stage-1 working-set target (v7x headroom)

# ---- host-side constant matrices (gather / segment-reduce / scatter on MXU) ----
_IDX_I = np.array([p[0] for p in PAIRS], np.int32)
_IDX_J = np.array([p[1] for p in PAIRS], np.int32)
_SEL_I = np.zeros((NUM_PAIRS, ITEM_NUM), np.float32)
_SEL_I[np.arange(NUM_PAIRS), _IDX_I] = 1.0
_SEL_J = np.zeros((NUM_PAIRS, ITEM_NUM), np.float32)
_SEL_J[np.arange(NUM_PAIRS), _IDX_J] = 1.0

_SEG_SEL = np.zeros((SLAB_DIM, 4), np.float32)                # channel -> level sum
for _l, (_st, _wd) in enumerate(_REL_SEGS):
    _SEG_SEL[_st:_st + _wd, _l] = 1.0

_EXPAND = np.tile(np.eye(4, dtype=np.float32), (1, NUM_PAIRS))   # (4, 112)
_PAT_BASE = np.zeros((NUM_PAIRS, NUM_RELA), np.float32)          # (28, 112)
for _p in range(NUM_PAIRS):
    _PAT_BASE[_p, 4 * _p:4 * _p + 4] = 1.0

# kernel relation order is pair-major (p*4 + level); reference order is
# level-major (level*28 + p).  _PERM maps kernel order -> reference order.
_PERM = np.array([l * NUM_PAIRS + p for p in range(NUM_PAIRS) for l in range(4)],
                 np.int32)


# ----------------------------- Pallas kernels -----------------------------

def _backbone_kernel(x_ref, w_ref, b_ref, slab_ref):
    # CNN surrogate: global average pool over spatial, then one fused projection
    # into the 640-wide feature slab (all four levels at once).  The 1/HW scale
    # is folded into w; x arrives in its HBM dtype (bf16 halves DMA bytes).
    x = x_ref[...].astype(jnp.float32)                       # (tn, C, HWp)
    pooled = jnp.sum(x, axis=-1)                             # (tn, C)
    slab_ref[...] = (jnp.dot(pooled, w_ref[...],
                             preferred_element_type=jnp.float32) + b_ref[...])


def _relation_head_kernel(x_ref, mtile_ref, seli_ref, selj_ref, segsel_ref,
                          expand_ref, pat_ref, bsum_ref,
                          w1_ref, b1_ref, w2_ref, b2_ref, out_ref):
    # TB batch elements per grid step: all TB*28 masked-cosine relations for the
    # 4 feature levels, then the (BN-folded) predictor MLP + sigmoid.
    x = x_ref[...]                                           # (TB*7, 640)
    # gather left/right operands for all pairs via block-diagonal one-hot matmuls
    left = jnp.dot(seli_ref[...], x, preferred_element_type=jnp.float32)
    right = jnp.dot(selj_ref[...], x, preferred_element_type=jnp.float32)
    m = mtile_ref[...]                                       # (TB*28, 640) resident
    ml = m * left
    mr = m * right
    seg = segsel_ref[...]                                    # (640, 4)
    # per-level dot products / squared norms as MXU segment reductions
    d = jnp.dot(ml * mr, seg, preferred_element_type=jnp.float32)    # (TB*28, 4)
    n2l = jnp.dot(ml * ml, seg, preferred_element_type=jnp.float32)
    n2r = jnp.dot(mr * mr, seg, preferred_element_type=jnp.float32)
    inv = (jax.lax.rsqrt(jnp.maximum(n2l, NORM_EPS2)) *      # EUP, ~free slot
           jax.lax.rsqrt(jnp.maximum(n2r, NORM_EPS2)))
    rel4 = d * inv                                           # (TB*28, 4)
    # scatter (pair, level) into a lane-dense (TB, 112) relation row: broadcast
    # the 4 level values across pair slots, mask each row's own slot, then sum
    # each batch element's 28 pair-rows with a one-hot matmul (all MXU/VPU,
    # no sublane->lane relayouts).
    rel_rows = jnp.dot(rel4, expand_ref[...],
                       preferred_element_type=jnp.float32) * pat_ref[...]
    rel = jnp.dot(bsum_ref[...], rel_rows,
                  preferred_element_type=jnp.float32)        # (TB, 112)
    # BatchNorm1d(eval) is folded into w1/b1 in the wrapper.
    h = jnp.maximum(jnp.dot(rel, w1_ref[...],
                            preferred_element_type=jnp.float32) + b1_ref[...], 0.0)
    y = jnp.dot(h, w2_ref[...], preferred_element_type=jnp.float32) + b2_ref[...]
    out_ref[...] = jax.nn.sigmoid(y)                         # (TB, 1)


# ----------------------------- wrappers -----------------------------------

def _choose_tn(N, C, HWp, in_itemsize):
    """Largest stage-1 row tile whose working set fits the VMEM budget."""
    resident = 2 * (C * SLAB_DIM * 4 + SLAB_DIM * 4)
    tn = 8
    for cand in (1024, 512, 256, 128, 64, 32, 16, 8):
        # 2x input buffers + in-kernel f32 cast temp + 2x output buffers
        byts = cand * C * HWp * (2 * in_itemsize + 4) + 2 * cand * SLAB_DIM * 4
        if byts + resident <= _STAGE1_BUDGET:
            tn = cand
            break
    if N <= tn:
        return N          # single full block: always layout-legal, no raggedness
    return tn             # multiple of 8; last block (if ragged) is masked


def _choose_tb(B):
    """Batch elements per stage-2 grid step (amortizes the ~0.35us/step cost)."""
    if B <= 8:
        return B          # single grid step; block equals the full slab
    if B % 16 == 0 and B >= 32:
        return 16
    return 8


def mcn_forward(params, images):
    B, I, C, H, W = images.shape
    assert I == ITEM_NUM
    N = B * I
    HW = H * W
    f32 = jnp.float32

    # ---- parameter plumbing (tiny, param-sized, fused under jit) ----
    # 1/HW global-average-pool scale folded into the projection weights.
    w_slab = jnp.concatenate([
        params["w_feat"],
        jnp.pad(params["w_l1"], ((0, 0), (0, EMBED - L1_DIM))),
        params["w_l2"], params["w_l3"]], axis=1) * (1.0 / HW)       # (C, 640)
    b_slab = jnp.concatenate([
        params["b_feat"],
        jnp.pad(params["b_l1"], ((0, 0), (0, EMBED - L1_DIM))),
        params["b_l2"], params["b_l3"]], axis=1)                    # (1, 640)

    # ReLU only on the feat-level masks, as in the reference.
    relu_masks = jnp.maximum(params["masks"], 0.0)                  # (28, 128)
    mask_slab = jnp.concatenate([
        relu_masks,
        jnp.pad(params["masks_l1"], ((0, 0), (0, EMBED - L1_DIM))),
        params["masks_l2"], params["masks_l3"]], axis=1)            # (28, 640)

    # Fold eval-mode BatchNorm1d into the first predictor Linear, permuting the
    # reference level-major relation order to the kernel's pair-major order.
    gamma = params["bn_gamma"][_PERM]
    beta = params["bn_beta"][_PERM]
    mean = params["bn_mean"][_PERM]
    var = params["bn_var"][_PERM]
    scale = gamma / jnp.sqrt(var + BN_EPS)                          # (112,)
    shift = beta - mean * scale
    w1pt = params["w1"][:, _PERM].T                                 # (112, 128)
    w1e = w1pt * scale[:, None]                                     # (112, 128)
    b1e = shift[None, :] @ w1pt + params["b1"][None, :]             # (1, 128)
    w2col = params["w2"].T                                          # (128, 1)
    b2 = params["b2"].reshape(1, 1)                                 # (1, 1)

    # ---- 1) backbone surrogate: GAP + fused 640-wide projection ----
    x3d = images.reshape(N, C, HW)     # keep input dtype (bf16 halves DMA bytes)
    HWp = HW
    if HW % 128 != 0:
        # keep the lane dim dense in VMEM (e.g. real ResNet spatial 7*7=49)
        pad = (-HW) % 128
        x3d = jnp.pad(x3d, ((0, 0), (0, 0), (0, pad)))
        HWp = HW + pad
    tn = _choose_tn(N, C, HWp, x3d.dtype.itemsize)
    slab = pl.pallas_call(
        _backbone_kernel,
        out_shape=jax.ShapeDtypeStruct((N, SLAB_DIM), f32),
        grid=(pl.cdiv(N, tn),),
        in_specs=[pl.BlockSpec((tn, C, HWp), lambda r: (r, 0, 0)),
                  pl.BlockSpec((C, SLAB_DIM), lambda r: (0, 0)),
                  pl.BlockSpec((1, SLAB_DIM), lambda r: (0, 0))],
        out_specs=pl.BlockSpec((tn, SLAB_DIM), lambda r: (r, 0)),
        compiler_params=pltpu.CompilerParams(
            dimension_semantics=("parallel",),
            vmem_limit_bytes=_VMEM_LIMIT),
    )(x3d, w_slab, b_slab)

    # ---- 2) relations + (folded BN) + predictor MLP + sigmoid ----
    TB = _choose_tb(B)
    B_pad = -(-B // TB) * TB
    slab_p = slab
    if B_pad != B:
        # zero rows are numerically safe (cos -> 0); padded outputs are dropped
        slab_p = jnp.pad(slab, ((0, (B_pad - B) * ITEM_NUM), (0, 0)))

    mtile = jnp.tile(mask_slab, (TB, 1))                            # (TB*28, 640)
    sel_i = jnp.asarray(np.kron(np.eye(TB, dtype=np.float32), _SEL_I))
    sel_j = jnp.asarray(np.kron(np.eye(TB, dtype=np.float32), _SEL_J))
    bsum = jnp.asarray(np.kron(np.eye(TB, dtype=np.float32),
                               np.ones((1, NUM_PAIRS), np.float32)))
    pattern = jnp.asarray(np.tile(_PAT_BASE, (TB, 1)))              # (TB*28, 112)
    segsel = jnp.asarray(_SEG_SEL)                                  # (640, 4)
    expand = jnp.asarray(_EXPAND)                                   # (4, 112)

    res = lambda b: (0, 0)                                          # grid-resident
    out_pad = pl.pallas_call(
        _relation_head_kernel,
        out_shape=jax.ShapeDtypeStruct((B_pad, 1), f32),
        grid=(B_pad // TB,),
        in_specs=[pl.BlockSpec((TB * ITEM_NUM, SLAB_DIM), lambda b: (b, 0)),
                  pl.BlockSpec((TB * NUM_PAIRS, SLAB_DIM), res),
                  pl.BlockSpec((TB * NUM_PAIRS, TB * ITEM_NUM), res),
                  pl.BlockSpec((TB * NUM_PAIRS, TB * ITEM_NUM), res),
                  pl.BlockSpec((SLAB_DIM, 4), res),
                  pl.BlockSpec((4, NUM_RELA), res),
                  pl.BlockSpec((TB * NUM_PAIRS, NUM_RELA), res),
                  pl.BlockSpec((TB, TB * NUM_PAIRS), res),
                  pl.BlockSpec((NUM_RELA, HIDDEN), res),
                  pl.BlockSpec((1, HIDDEN), res),
                  pl.BlockSpec((HIDDEN, 1), res),
                  pl.BlockSpec((1, 1), res)],
        out_specs=pl.BlockSpec((TB, 1), lambda b: (b, 0)),
        compiler_params=pltpu.CompilerParams(
            dimension_semantics=("parallel",),
            vmem_limit_bytes=_VMEM_LIMIT),
    )(slab_p, mtile, sel_i, sel_j, segsel, expand, pattern, bsum,
      w1e, b1e, w2col, b2)
    out = out_pad[:B]

    # ---- type / representation losses (tiny reductions; plain jnp) ----
    tmasks_loss = jnp.sum(relu_masks) / float(NUM_PAIRS)            # L1 of relu'd masks
    feat = slab[:, :EMBED]                                          # (N, 128)
    features_loss = jnp.sqrt(jnp.sum(feat * feat)) / np.sqrt(N)     # ||F||_2 / sqrt(B*I)

    return out, tmasks_loss, features_loss


# ----------------------------- parameters ---------------------------------

def init_params(key, channels):
    ks = jax.random.split(key, 12)

    def normal(k, shape, mean, std):
        return mean + std * jax.random.normal(k, shape, jnp.float32)

    def xavier(k, shape):
        lim = np.sqrt(6.0 / (shape[0] + shape[1]))
        return jax.random.uniform(k, shape, jnp.float32, -lim, lim)

    return dict(
        # mask embeddings (28 pairs), init normal_(0.9, 0.7) as in the module
        masks=normal(ks[0], (NUM_PAIRS, EMBED), 0.9, 0.7),
        masks_l1=normal(ks[1], (NUM_PAIRS, L1_DIM), 0.9, 0.7),
        masks_l2=normal(ks[2], (NUM_PAIRS, L2_DIM), 0.9, 0.7),
        masks_l3=normal(ks[3], (NUM_PAIRS, L3_DIM), 0.9, 0.7),
        # CNN surrogate projections (stand-in for ResNet + cnn.fc)
        w_feat=xavier(ks[4], (channels, EMBED)), b_feat=jnp.zeros((1, EMBED), jnp.float32),
        w_l1=xavier(ks[5], (channels, L1_DIM)), b_l1=jnp.zeros((1, L1_DIM), jnp.float32),
        w_l2=xavier(ks[6], (channels, L2_DIM)), b_l2=jnp.zeros((1, L2_DIM), jnp.float32),
        w_l3=xavier(ks[7], (channels, L3_DIM)), b_l3=jnp.zeros((1, L3_DIM), jnp.float32),
        # BatchNorm1d(num_rela), PyTorch default init, eval mode
        bn_gamma=jnp.ones((NUM_RELA,), jnp.float32),
        bn_beta=jnp.zeros((NUM_RELA,), jnp.float32),
        bn_mean=jnp.zeros((NUM_RELA,), jnp.float32),
        bn_var=jnp.ones((NUM_RELA,), jnp.float32),
        # predictor: Linear(112,128) + ReLU + Linear(128,1), torch (out,in) layout
        w1=xavier(ks[8], (HIDDEN, NUM_RELA)), b1=jnp.zeros((HIDDEN,), jnp.float32),
        w2=xavier(ks[9], (1, HIDDEN)), b2=jnp.zeros((1,), jnp.float32),
    )


if __name__ == "__main__":
    key = jax.random.PRNGKey(0)
    kp, kx = jax.random.split(key)
    B, I, C, H, W = 2, ITEM_NUM, 4, 16, 16
    params = init_params(kp, C)
    # bf16 images halve the stage-1 HBM->VMEM DMA bytes (f32 inputs also work).
    images = jax.random.normal(kx, (B, I, C, H, W), jnp.float32).astype(jnp.bfloat16)

    out, tmasks_loss, features_loss = jax.jit(mcn_forward)(params, images)
    jax.block_until_ready((out, tmasks_loss, features_loss))
    assert out.shape == (B, 1)
    assert bool(jnp.all(jnp.isfinite(out)))
    print("KERNEL_OK")
</pallas_src>

<mosaic_0001>
module attributes {stable_mosaic.version = 11 : i64} {
  func.func @_backbone_kernel(%arg0: i32, %arg1: memref<14x4x256xbf16, #tpu.memory_space<vmem>>, %arg2: memref<4x640xf32, #tpu.memory_space<vmem>>, %arg3: memref<1x640xf32, #tpu.memory_space<vmem>>, %arg4: memref<14x640xf32, #tpu.memory_space<vmem>>) attributes {dimension_semantics = [#tpu.dimension_semantics<parallel>], iteration_bounds = array<i64: 1>, scalar_prefetch = 0 : i64, scratch_operands = 0 : i64, tpu.core_type = #tpu.core_type<tc>, window_params = [{transform_indices = @transform_0, window_bounds = array<i64: 14, 4, 256>}, {pipeline_mode = #tpu.pipeline_mode<synchronous>, transform_indices = @transform_1, window_bounds = array<i64: 4, 640>}, {pipeline_mode = #tpu.pipeline_mode<synchronous>, transform_indices = @transform_2, window_bounds = array<i64: 1, 640>}, {transform_indices = @transform_3, window_bounds = array<i64: 14, 640>}]} {
    %c0 = arith.constant 0 : index
    %c0_0 = arith.constant 0 : index
    %c0_1 = arith.constant 0 : index
    %0 = vector.load %arg1[%c0, %c0_0, %c0_1] : memref<14x4x256xbf16, #tpu.memory_space<vmem>>, vector<14x4x256xbf16>
    %1 = arith.extf %0 : vector<14x4x256xbf16> to vector<14x4x256xf32>
    %cst = arith.constant dense<0.000000e+00> : vector<14x4xf32>
    %2 = vector.multi_reduction <add>, %1, %cst [2] : vector<14x4x256xf32> to vector<14x4xf32>
    %c0_2 = arith.constant 0 : index
    %c0_3 = arith.constant 0 : index
    %3 = vector.load %arg2[%c0_2, %c0_3] : memref<4x640xf32, #tpu.memory_space<vmem>>, vector<4x640xf32>
    %cst_4 = arith.constant dense<0.000000e+00> : vector<14x640xf32>
    %4 = tpu.matmul %2, %3, %cst_4 {dimension_numbers = #tpu.dot_dimension_numbers<[1], [0], [0], [1], [0, 0, 1, 1], [], []>} : vector<14x4xf32>, vector<4x640xf32>, vector<14x640xf32> -> vector<14x640xf32>
    %c0_5 = arith.constant 0 : index
    %c0_6 = arith.constant 0 : index
    %5 = vector.load %arg3[%c0_5, %c0_6] : memref<1x640xf32, #tpu.memory_space<vmem>>, vector<1x640xf32>
    %6 = vector.broadcast %5 : vector<1x640xf32> to vector<14x640xf32>
    %7 = arith.addf %4, %6 : vector<14x640xf32>
    %c0_7 = arith.constant 0 : index
    %c0_8 = arith.constant 0 : index
    %8 = vector.load %arg4[%c0_7, %c0_8] : memref<14x640xf32, #tpu.memory_space<vmem>>, vector<14x640xf32>
    tpu.vector_store %arg4[%c0_7, %c0_8], %7 {strides = array<i32>} : memref<14x640xf32, #tpu.memory_space<vmem>>, vector<14x640xf32>,
    return
  }
  func.func @transform_0(%arg0: i32) -> (i32, i32, i32) {
    %c0_i32 = arith.constant 0 : i32
    %c0_i32_0 = arith.constant 0 : i32
    %c0_i32_1 = arith.constant 0 : i32
    return %arg0, %c0_i32, %c0_i32_0 : i32, i32, i32
  }
  func.func @transform_1(%arg0: i32) -> (i32, i32) {
    %c0_i32 = arith.constant 0 : i32
    %c0_i32_0 = arith.constant 0 : i32
    %c0_i32_1 = arith.constant 0 : i32
    return %c0_i32, %c0_i32_0 : i32, i32
  }
  func.func @transform_2(%arg0: i32) -> (i32, i32) {
    %c0_i32 = arith.constant 0 : i32
    %c0_i32_0 = arith.constant 0 : i32
    %c0_i32_1 = arith.constant 0 : i32
    return %c0_i32, %c0_i32_0 : i32, i32
  }
  func.func @transform_3(%arg0: i32) -> (i32, i32) {
    %c0_i32 = arith.constant 0 : i32
    %c0_i32_0 = arith.constant 0 : i32
    return %arg0, %c0_i32 : i32, i32
  }
}

module attributes {stable_mosaic.version = 11 : i64} {
  func.func @_relation_head_kernel(%arg0: i32, %arg1: memref<14x640xf32, #tpu.memory_space<vmem>>, %arg2: memref<56x640xf32, #tpu.memory_space<vmem>>, %arg3: memref<56x14xf32, #tpu.memory_space<vmem>>, %arg4: memref<56x14xf32, #tpu.memory_space<vmem>>, %arg5: memref<640x4xf32, #tpu.memory_space<vmem>>, %arg6: memref<4x112xf32, #tpu.memory_space<vmem>>, %arg7: memref<56x112xf32, #tpu.memory_space<vmem>>, %arg8: memref<2x56xf32, #tpu.memory_space<vmem>>, %arg9: memref<112x128xf32, #tpu.memory_space<vmem>>, %arg10: memref<1x128xf32, #tpu.memory_space<vmem>>, %arg11: memref<128x1xf32, #tpu.memory_space<vmem>>, %arg12: memref<1x1xf32, #tpu.memory_space<vmem>>, %arg13: memref<2x1xf32, #tpu.memory_space<vmem>>) attributes {dimension_semantics = [#tpu.dimension_semantics<parallel>], iteration_bounds = array<i64: 1>, scalar_prefetch = 0 : i64, scratch_operands = 0 : i64, tpu.core_type = #tpu.core_type<tc>, window_params = [{transform_indices = @transform_0, window_bounds = array<i64: 14, 640>}, {pipeline_mode = #tpu.pipeline_mode<synchronous>, transform_indices = @transform_1, window_bounds = array<i64: 56, 640>}, {pipeline_mode = #tpu.pipeline_mode<synchronous>, transform_indices = @transform_2, window_bounds = array<i64: 56, 14>}, {pipeline_mode = #tpu.pipeline_mode<synchronous>, transform_indices = @transform_3, window_bounds = array<i64: 56, 14>}, {pipeline_mode = #tpu.pipeline_mode<synchronous>, transform_indices = @transform_4, window_bounds = array<i64: 640, 4>}, {pipeline_mode = #tpu.pipeline_mode<synchronous>, transform_indices = @transform_5, window_bounds = array<i64: 4, 112>}, {pipeline_mode = #tpu.pipeline_mode<synchronous>, transform_indices = @transform_6, window_bounds = array<i64: 56, 112>}, {pipeline_mode = #tpu.pipeline_mode<synchronous>, transform_indices = @transform_7, window_bounds = array<i64: 2, 56>}, {pipeline_mode = #tpu.pipeline_mode<synchronous>, transform_indices = @transform_8, window_bounds = array<i64: 112, 128>}, {pipeline_mode = #tpu.pipeline_mode<synchronous>, transform_indices = @transform_9, window_bounds = array<i64: 1, 128>}, {pipeline_mode = #tpu.pipeline_mode<synchronous>, transform_indices = @transform_10, window_bounds = array<i64: 128, 1>}, {pipeline_mode = #tpu.pipeline_mode<synchronous>, transform_indices = @transform_11, window_bounds = array<i64: 1, 1>}, {transform_indices = @transform_12, window_bounds = array<i64: 2, 1>}]} {
    %c0 = arith.constant 0 : index
    %c0_0 = arith.constant 0 : index
    %0 = vector.load %arg1[%c0, %c0_0] : memref<14x640xf32, #tpu.memory_space<vmem>>, vector<14x640xf32>
    %c0_1 = arith.constant 0 : index
    %c0_2 = arith.constant 0 : index
    %1 = vector.load %arg3[%c0_1, %c0_2] : memref<56x14xf32, #tpu.memory_space<vmem>>, vector<56x14xf32>
    %cst = arith.constant dense<0.000000e+00> : vector<56x640xf32>
    %2 = tpu.matmul %1, %0, %cst {dimension_numbers = #tpu.dot_dimension_numbers<[1], [0], [0], [1], [0, 0, 1, 1], [], []>} : vector<56x14xf32>, vector<14x640xf32>, vector<56x640xf32> -> vector<56x640xf32>
    %c0_3 = arith.constant 0 : index
    %c0_4 = arith.constant 0 : index
    %3 = vector.load %arg4[%c0_3, %c0_4] : memref<56x14xf32, #tpu.memory_space<vmem>>, vector<56x14xf32>
    %cst_5 = arith.constant dense<0.000000e+00> : vector<56x640xf32>
    %4 = tpu.matmul %3, %0, %cst_5 {dimension_numbers = #tpu.dot_dimension_numbers<[1], [0], [0], [1], [0, 0, 1, 1], [], []>} : vector<56x14xf32>, vector<14x640xf32>, vector<56x640xf32> -> vector<56x640xf32>
    %c0_6 = arith.constant 0 : index
    %c0_7 = arith.constant 0 : index
    %5 = vector.load %arg2[%c0_6, %c0_7] : memref<56x640xf32, #tpu.memory_space<vmem>>, vector<56x640xf32>
    %6 = arith.mulf %5, %2 : vector<56x640xf32>
    %7 = arith.mulf %5, %4 : vector<56x640xf32>
    %c0_8 = arith.constant 0 : index
    %c0_9 = arith.constant 0 : index
    %8 = vector.load %arg5[%c0_8, %c0_9] : memref<640x4xf32, #tpu.memory_space<vmem>>, vector<640x4xf32>
    %9 = arith.mulf %6, %7 : vector<56x640xf32>
    %cst_10 = arith.constant dense<0.000000e+00> : vector<56x4xf32>
    %10 = tpu.matmul %9, %8, %cst_10 {dimension_numbers = #tpu.dot_dimension_numbers<[1], [0], [0], [1], [0, 0, 1, 1], [], []>} : vector<56x640xf32>, vector<640x4xf32>, vector<56x4xf32> -> vector<56x4xf32>
    %11 = arith.mulf %6, %6 : vector<56x640xf32>
    %cst_11 = arith.constant dense<0.000000e+00> : vector<56x4xf32>
    %12 = tpu.matmul %11, %8, %cst_11 {dimension_numbers = #tpu.dot_dimension_numbers<[1], [0], [0], [1], [0, 0, 1, 1], [], []>} : vector<56x640xf32>, vector<640x4xf32>, vector<56x4xf32> -> vector<56x4xf32>
    %13 = arith.mulf %7, %7 : vector<56x640xf32>
    %cst_12 = arith.constant dense<0.000000e+00> : vector<56x4xf32>
    %14 = tpu.matmul %13, %8, %cst_12 {dimension_numbers = #tpu.dot_dimension_numbers<[1], [0], [0], [1], [0, 0, 1, 1], [], []>} : vector<56x640xf32>, vector<640x4xf32>, vector<56x4xf32> -> vector<56x4xf32>
    %cst_13 = arith.constant 1.000000e-24 : f32
    %15 = vector.broadcast %cst_13 : f32 to vector<56x4xf32>
    %16 = arith.maximumf %12, %15 : vector<56x4xf32>
    %17 = math.rsqrt %16 : vector<56x4xf32>
    %cst_14 = arith.constant 1.000000e-24 : f32
    %18 = vector.broadcast %cst_14 : f32 to vector<56x4xf32>
    %19 = arith.maximumf %14, %18 : vector<56x4xf32>
    %20 = math.rsqrt %19 : vector<56x4xf32>
    %21 = arith.mulf %17, %20 : vector<56x4xf32>
    %22 = arith.mulf %10, %21 : vector<56x4xf32>
    %c0_15 = arith.constant 0 : index
    %c0_16 = arith.constant 0 : index
    %23 = vector.load %arg6[%c0_15, %c0_16] : memref<4x112xf32, #tpu.memory_space<vmem>>, vector<4x112xf32>
    %cst_17 = arith.constant dense<0.000000e+00> : vector<56x112xf32>
    %24 = tpu.matmul %22, %23, %cst_17 {dimension_numbers = #tpu.dot_dimension_numbers<[1], [0], [0], [1], [0, 0, 1, 1], [], []>} : vector<56x4xf32>, vector<4x112xf32>, vector<56x112xf32> -> vector<56x112xf32>
    %c0_18 = arith.constant 0 : index
    %c0_19 = arith.constant 0 : index
    %25 = vector.load %arg7[%c0_18, %c0_19] : memref<56x112xf32, #tpu.memory_space<vmem>>, vector<56x112xf32>
    %26 = arith.mulf %24, %25 : vector<56x112xf32>
    %c0_20 = arith.constant 0 : index
    %c0_21 = arith.constant 0 : index
    %27 = vector.load %arg8[%c0_20, %c0_21] : memref<2x56xf32, #tpu.memory_space<vmem>>, vector<2x56xf32>
    %cst_22 = arith.constant dense<0.000000e+00> : vector<2x112xf32>
    %28 = tpu.matmul %27, %26, %cst_22 {dimension_numbers = #tpu.dot_dimension_numbers<[1], [0], [0], [1], [0, 0, 1, 1], [], []>} : vector<2x56xf32>, vector<56x112xf32>, vector<2x112xf32> -> vector<2x112xf32>
    %c0_23 = arith.constant 0 : index
    %c0_24 = arith.constant 0 : index
    %29 = vector.load %arg9[%c0_23, %c0_24] : memref<112x128xf32, #tpu.memory_space<vmem>>, vector<112x128xf32>
    %cst_25 = arith.constant dense<0.000000e+00> : vector<2x128xf32>
    %30 = tpu.matmul %28, %29, %cst_25 {dimension_numbers = #tpu.dot_dimension_numbers<[1], [0], [0], [1], [0, 0, 1, 1], [], []>} : vector<2x112xf32>, vector<112x128xf32>, vector<2x128xf32> -> vector<2x128xf32>
    %c0_26 = arith.constant 0 : index
    %c0_27 = arith.constant 0 : index
    %31 = vector.load %arg10[%c0_26, %c0_27] : memref<1x128xf32, #tpu.memory_space<vmem>>, vector<1x128xf32>
    %32 = vector.broadcast %31 : vector<1x128xf32> to vector<2x128xf32>
    %33 = arith.addf %30, %32 : vector<2x128xf32>
    %cst_28 = arith.constant 0.000000e+00 : f32
    %34 = vector.broadcast %cst_28 : f32 to vector<2x128xf32>
    %35 = arith.maximumf %33, %34 : vector<2x128xf32>
    %c0_29 = arith.constant 0 : index
    %c0_30 = arith.constant 0 : index
    %36 = vector.load %arg11[%c0_29, %c0_30] : memref<128x1xf32, #tpu.memory_space<vmem>>, vector<128x1xf32>
    %cst_31 = arith.constant dense<0.000000e+00> : vector<2x1xf32>
    %37 = tpu.matmul %35, %36, %cst_31 {dimension_numbers = #tpu.dot_dimension_numbers<[1], [0], [0], [1], [0, 0, 1, 1], [], []>} : vector<2x128xf32>, vector<128x1xf32>, vector<2x1xf32> -> vector<2x1xf32>
    %c0_32 = arith.constant 0 : index
    %c0_33 = arith.constant 0 : index
    %38 = vector.load %arg12[%c0_32, %c0_33] : memref<1x1xf32, #tpu.memory_space<vmem>>, vector<1x1xf32>
    %39 = vector.broadcast %38 : vector<1x1xf32> to vector<2x1xf32>
    %40 = arith.addf %37, %39 : vector<2x1xf32>
    %41 = arith.negf %40 : vector<2x1xf32>
    %42 = math.exp %41 : vector<2x1xf32>
    %cst_34 = arith.constant 1.000000e+00 : f32
    %43 = vector.broadcast %cst_34 : f32 to vector<2x1xf32>
    %44 = arith.addf %43, %42 : vector<2x1xf32>
    %45 = arith.divf %43, %44 : vector<2x1xf32>
    %c0_35 = arith.constant 0 : index
    %c0_36 = arith.constant 0 : index
    %46 = vector.load %arg13[%c0_35, %c0_36] : memref<2x1xf32, #tpu.memory_space<vmem>>, vector<2x1xf32>
    tpu.vector_store %arg13[%c0_35, %c0_36], %45 {strides = array<i32>} : memref<2x1xf32, #tpu.memory_space<vmem>>, vector<2x1xf32>,
    return
  }
  func.func @transform_0(%arg0: i32) -> (i32, i32) {
    %c0_i32 = arith.constant 0 : i32
    %c0_i32_0 = arith.constant 0 : i32
    return %arg0, %c0_i32 : i32, i32
  }
  func.func @transform_1(%arg0: i32) -> (i32, i32) {
    %c0_i32 = arith.constant 0 : i32
    %c0_i32_0 = arith.constant 0 : i32
    %c0_i32_1 = arith.constant 0 : i32
    return %c0_i32, %c0_i32_0 : i32, i32
  }
  func.func @transform_2(%arg0: i32) -> (i32, i32) {
    %c0_i32 = arith.constant 0 : i32
    %c0_i32_0 = arith.constant 0 : i32
    %c0_i32_1 = arith.constant 0 : i32
    return %c0_i32, %c0_i32_0 : i32, i32
  }
  func.func @transform_3(%arg0: i32) -> (i32, i32) {
    %c0_i32 = arith.constant 0 : i32
    %c0_i32_0 = arith.constant 0 : i32
    %c0_i32_1 = arith.constant 0 : i32
    return %c0_i32, %c0_i32_0 : i32, i32
  }
  func.func @transform_4(%arg0: i32) -> (i32, i32) {
    %c0_i32 = arith.constant 0 : i32
    %c0_i32_0 = arith.constant 0 : i32
    %c0_i32_1 = arith.constant 0 : i32
    return %c0_i32, %c0_i32_0 : i32, i32
  }
  func.func @transform_5(%arg0: i32) -> (i32, i32) {
    %c0_i32 = arith.constant 0 : i32
    %c0_i32_0 = arith.constant 0 : i32
    %c0_i32_1 = arith.constant 0 : i32
    return %c0_i32, %c0_i32_0 : i32, i32
  }
  func.func @transform_6(%arg0: i32) -> (i32, i32) {
    %c0_i32 = arith.constant 0 : i32
    %c0_i32_0 = arith.constant 0 : i32
    %c0_i32_1 = arith.constant 0 : i32
    return %c0_i32, %c0_i32_0 : i32, i32
  }
  func.func @transform_7(%arg0: i32) -> (i32, i32) {
    %c0_i32 = arith.constant 0 : i32
    %c0_i32_0 = arith.constant 0 : i32
    %c0_i32_1 = arith.constant 0 : i32
    return %c0_i32, %c0_i32_0 : i32, i32
  }
  func.func @transform_8(%arg0: i32) -> (i32, i32) {
    %c0_i32 = arith.constant 0 : i32
    %c0_i32_0 = arith.constant 0 : i32
    %c0_i32_1 = arith.constant 0 : i32
    return %c0_i32, %c0_i32_0 : i32, i32
  }
  func.func @transform_9(%arg0: i32) -> (i32, i32) {
    %c0_i32 = arith.constant 0 : i32
    %c0_i32_0 = arith.constant 0 : i32
    %c0_i32_1 = arith.constant 0 : i32
    return %c0_i32, %c0_i32_0 : i32, i32
  }
  func.func @transform_10(%arg0: i32) -> (i32, i32) {
    %c0_i32 = arith.constant 0 : i32
    %c0_i32_0 = arith.constant 0 : i32
    %c0_i32_1 = arith.constant 0 : i32
    return %c0_i32, %c0_i32_0 : i32, i32
  }
  func.func @transform_11(%arg0: i32) -> (i32, i32) {
    %c0_i32 = arith.constant 0 : i32
    %c0_i32_0 = arith.constant 0 : i32
    %c0_i32_1 = arith.constant 0 : i32
    return %c0_i32, %c0_i32_0 : i32, i32
  }
  func.func @transform_12(%arg0: i32) -> (i32, i32) {
    %c0_i32 = arith.constant 0 : i32
    %c0_i32_0 = arith.constant 0 : i32
    return %arg0, %c0_i32 : i32, i32
  }
}

</mosaic_0001>

<bundles_post_ra>
// kernel: tile.9
= control target key start
LH: loop header
LB: loop body
LE: loop exit
PB: predicated region body
PF: predicated region fallthrough
CT: control target
= control target key end

     0   :  { %s578_s0 = inlined_call_operand.vmem [shape: f32[2,28,640], index: 0, kind: input, shape index: {}]   ;;  %s579_s1 = inlined_call_operand.vmem [shape: f32[56,640], index: 1, kind: output, shape index: {}]  }
   0x1   :  { %v2_v0 = vld [vmem:[%s578_s0] sm:$0xff]   ;;  %v190_v1 = vld [vmem:[%s578_s0 + $0x8] sm:$0xff]   ;;  %v192_v2 = vld [vmem:[%s578_s0 + $0x10] sm:$0xff]  }
   0x2   :  { %3 = vst [vmem:[%s579_s1] sm:$0xff] %v2_v0   ;;  %191 = vst [vmem:[%s579_s1 + $0x8] sm:$0xff] %v190_v1   ;;  %v194_v3 = vld [vmem:[%s578_s0 + $0x18] sm:$0xff]   ;;  %v196_v4 = vld [vmem:[%s578_s0 + $0x20] sm:$0xff]  }
   0x3   :  { %193 = vst [vmem:[%s579_s1 + $0x10] sm:$0xff] %v192_v2   ;;  %v198_v5 = vld [vmem:[%s578_s0 + $0x28] sm:$0xff]   ;;  %195 = vst [vmem:[%s579_s1 + $0x18] sm:$0xff] %v194_v3   ;;  %v200_v6 = vld [vmem:[%s578_s0 + $0x30] sm:$0xff]  }
   0x4   :  { %197 = vst [vmem:[%s579_s1 + $0x20] sm:$0xff] %v196_v4   ;;  %199 = vst [vmem:[%s579_s1 + $0x28] sm:$0xff] %v198_v5   ;;  %v202_v7 = vld [vmem:[%s578_s0 + $0x38] sm:$0xff]   ;;  %v204_v8 = vld [vmem:[%s578_s0 + $0x40] sm:$0xff]  }
   0x5   :  { %201 = vst [vmem:[%s579_s1 + $0x30] sm:$0xff] %v200_v6   ;;  %203 = vst [vmem:[%s579_s1 + $0x38] sm:$0xff] %v202_v7   ;;  %v206_v9 = vld [vmem:[%s578_s0 + $0x48] sm:$0xff]   ;;  %v208_v10 = vld [vmem:[%s578_s0 + $0x50] sm:$0xff]  }
   0x6   :  { %205 = vst [vmem:[%s579_s1 + $0x40] sm:$0xff] %v204_v8   ;;  %v210_v11 = vld [vmem:[%s578_s0 + $0x58] sm:$0xff]   ;;  %207 = vst [vmem:[%s579_s1 + $0x48] sm:$0xff] %v206_v9   ;;  %v212_v12 = vld [vmem:[%s578_s0 + $0x60] sm:$0xff]  }
   0x7   :  { %209 = vst [vmem:[%s579_s1 + $0x50] sm:$0xff] %v208_v10   ;;  %211 = vst [vmem:[%s579_s1 + $0x58] sm:$0xff] %v210_v11   ;;  %v214_v13 = vld [vmem:[%s578_s0 + $0x68] sm:$0xff]   ;;  %v216_v14 = vld [vmem:[%s578_s0 + $0x70] sm:$0xff]  }
   0x8   :  { %213 = vst [vmem:[%s579_s1 + $0x60] sm:$0xff] %v212_v12   ;;  %215 = vst [vmem:[%s579_s1 + $0x68] sm:$0xff] %v214_v13   ;;  %v218_v15 = vld [vmem:[%s578_s0 + $0x78] sm:$0xf]   ;;  %v220_v16 = vld [vmem:[%s578_s0 + $0x80] sm:$0xf]  }
   0x9   :  { %217 = vst [vmem:[%s579_s1 + $0x70] sm:$0xff] %v216_v14   ;;  %v222_v17 = vld [vmem:[%s578_s0 + $0x88] sm:$0xf]   ;;  %219 = vst [vmem:[%s579_s1 + $0x78] sm:$0xf] %v218_v15   ;;  %v228_v20 = vld [vmem:[%s578_s0 + $0xa0] sm:$0xff]  }
   0xa   :  { %221 = vst [vmem:[%s579_s1 + $0x80] sm:$0xf] %v220_v16   ;;  %223 = vst [vmem:[%s579_s1 + $0x88] sm:$0xf] %v222_v17   ;;  %v224_v18 = vld [vmem:[%s578_s0 + $0x90] sm:$0xf]  }
   0xb   :  { %v226_v19 = vld [vmem:[%s578_s0 + $0x98] sm:$0xf]   ;;  %225 = vst [vmem:[%s579_s1 + $0x90] sm:$0xf] %v224_v18   ;;  %229 = vst [vmem:[%s579_s1 + $0x7c] sm:$0xf] %v228_v20  }
   0xc   :  { %227 = vst [vmem:[%s579_s1 + $0x98] sm:$0xf] %v226_v19   ;;  %230 = vst [vmem:[%s579_s1 + $0x9c] sm:$0xf0] %v228_v20   ;;  %v231_v21 = vld [vmem:[%s578_s0 + $0xa8] sm:$0xff]   ;;  %v234_v22 = vld [vmem:[%s578_s0 + $0xb0] sm:$0xff]  }
   0xd   :  { %v237_v23 = vld [vmem:[%s578_s0 + $0xb8] sm:$0xff]   ;;  %232 = vst [vmem:[%s579_s1 + $0x84] sm:$0xf] %v231_v21   ;;  %233 = vst [vmem:[%s579_s1 + $0xa4] sm:$0xf0] %v231_v21   ;;  %v240_v24 = vld [vmem:[%s578_s0 + $0xc0] sm:$0xff]  }
   0xe   :  { %235 = vst [vmem:[%s579_s1 + $0x8c] sm:$0xf] %v234_v22   ;;  %236 = vst [vmem:[%s579_s1 + $0xac] sm:$0xf0] %v234_v22   ;;  %v243_v25 = vld [vmem:[%s578_s0 + $0xc8] sm:$0xff]   ;;  %v246_v26 = vld [vmem:[%s578_s0 + $0xd0] sm:$0xff]  }
   0xf   :  { %238 = vst [vmem:[%s579_s1 + $0x94] sm:$0xf] %v237_v23   ;;  %239 = vst [vmem:[%s579_s1 + $0xb4] sm:$0xf0] %v237_v23   ;;  %v249_v27 = vld [vmem:[%s578_s0 + $0xd8] sm:$0xff]   ;;  %v252_v28 = vld [vmem:[%s578_s0 + $0xe0] sm:$0xff]  }
  0x10   :  { %241 = vst [vmem:[%s579_s1 + $0x9c] sm:$0xf] %v240_v24   ;;  %242 = vst [vmem:[%s579_s1 + $0xbc] sm:$0xf0] %v240_v24   ;;  %v255_v29 = vld [vmem:[%s578_s0 + $0xe8] sm:$0xff]   ;;  %v258_v30 = vld [vmem:[%s578_s0 + $0xf0] sm:$0xff]  }
  0x11   :  { %244 = vst [vmem:[%s579_s1 + $0xa4] sm:$0xf] %v243_v25   ;;  %245 = vst [vmem:[%s579_s1 + $0xc4] sm:$0xf0] %v243_v25   ;;  %v261_v31 = vld [vmem:[%s578_s0 + $0xf8] sm:$0xff]   ;;  %v264_v32 = vld [vmem:[%s578_s0 + $0x100] sm:$0xff]  }
  0x12   :  { %247 = vst [vmem:[%s579_s1 + $0xac] sm:$0xf] %v246_v26   ;;  %248 = vst [vmem:[%s579_s1 + $0xcc] sm:$0xf0] %v246_v26   ;;  %v267_v33 = vld [vmem:[%s578_s0 + $0x108] sm:$0xff]   ;;  %v270_v34 = vld [vmem:[%s578_s0 + $0x110] sm:$0xff]  }
  0x13   :  { %250 = vst [vmem:[%s579_s1 + $0xb4] sm:$0xf] %v249_v27   ;;  %251 = vst [vmem:[%s579_s1 + $0xd4] sm:$0xf0] %v249_v27   ;;  %v273_v35 = vld [vmem:[%s578_s0 + $0x118] sm:$0xf]  }
  0x14   :  { %253 = vst [vmem:[%s579_s1 + $0xbc] sm:$0xf] %v252_v28   ;;  %254 = vst [vmem:[%s579_s1 + $0xdc] sm:$0xf0] %v252_v28   ;;  %v275_v36 = vld [vmem:[%s578_s0 + $0x120] sm:$0xf]  }
  0x15   :  { %256 = vst [vmem:[%s579_s1 + $0xc4] sm:$0xf] %v255_v29   ;;  %257 = vst [vmem:[%s579_s1 + $0xe4] sm:$0xf0] %v255_v29   ;;  %v277_v37 = vld [vmem:[%s578_s0 + $0x128] sm:$0xf]  }
  0x16   :  { %259 = vst [vmem:[%s579_s1 + $0xcc] sm:$0xf] %v258_v30   ;;  %260 = vst [vmem:[%s579_s1 + $0xec] sm:$0xf0] %v258_v30   ;;  %v279_v38 = vld [vmem:[%s578_s0 + $0x130] sm:$0xf]  }
  0x17   :  { %262 = vst [vmem:[%s579_s1 + $0xd4] sm:$0xf] %v261_v31   ;;  %263 = vst [vmem:[%s579_s1 + $0xf4] sm:$0xf0] %v261_v31   ;;  %v281_v39 = vld [vmem:[%s578_s0 + $0x138] sm:$0xf]  }
  0x18   :  { %265 = vst [vmem:[%s579_s1 + $0xdc] sm:$0xf] %v264_v32   ;;  %266 = vst [vmem:[%s579_s1 + $0xfc] sm:$0xf0] %v264_v32  }
  0x19   :  { %268 = vst [vmem:[%s579_s1 + $0xe4] sm:$0xf] %v267_v33   ;;  %269 = vst [vmem:[%s579_s1 + $0x104] sm:$0xf0] %v267_v33  }
  0x1a   :  { %271 = vst [vmem:[%s579_s1 + $0xec] sm:$0xf] %v270_v34   ;;  %272 = vst [vmem:[%s579_s1 + $0x10c] sm:$0xf0] %v270_v34  }
  0x1b   :  { %274 = vst [vmem:[%s579_s1 + $0xf4] sm:$0xf] %v273_v35   ;;  %276 = vst [vmem:[%s579_s1 + $0xfc] sm:$0xf] %v275_v36  }
  0x1c   :  { %278 = vst [vmem:[%s579_s1 + $0x104] sm:$0xf] %v277_v37   ;;  %280 = vst [vmem:[%s579_s1 + $0x10c] sm:$0xf] %v279_v38  }
  0x1d   :  { %282 = vst [vmem:[%s579_s1 + $0x114] sm:$0xf] %v281_v39  }

// kernel: mcn_forward.2
= control target key start
LH: loop header
LB: loop body
LE: loop exit
PB: predicated region body
PF: predicated region fallthrough
CT: control target
= control target key end

     0   :  { %vm84_vm0 = vcmask 1043456   ;;  %vm257_vm1 = vcmask 1041409   ;;  %vm259_vm2 = vcmask 1042434   ;;  %vm261_vm3 = vcmask 1043459   ;;  %s737_s0 = inlined_call_operand.vmem [shape: bf16[14,4,256], index: 0, kind: input, shape index: {}]   ;;  %s738_s1 = inlined_call_operand.vmem [shape: f32[4,640], index: 1, kind: input, shape index: {}]   ;;  %s739_s2 = inlined_call_operand.vmem [shape: f32[1,640], index: 2, kind: input, shape index: {}]   ;;  %s740_s3 = inlined_call_operand.vmem [shape: f32[14,640], index: 3, kind: output, shape index: {}]  }
   0x1   :  { %v578_v0 = vld [vmem:[%s737_s0 + $0x8] sm:$0xff]   ;;  %v551_v1 = vld [vmem:[%s737_s0] sm:$0xff]   ;;  %v579_v2 = vld [vmem:[%s737_s0 + $0x10] sm:$0xff]   ;;  %vm263_vm4 = vcmask 1044484   ;;  %vm265_vm5 = vcmask 1045509   ;;  %vm267_vm6 = vcmask 1046534  }
   0x2   :  { %v556_v3 = vunpack.c.l.bf16 %v578_v0  ;;  %v552_v4 = vunpack.c.l.bf16 %v551_v1  ;;  %v557_v5 = vunpack.c.h.bf16 %v578_v0  ;;  %v553_v6 = vunpack.c.h.bf16 %v551_v1  ;;  %v580_v7 = vld [vmem:[%s737_s0 + $0x18] sm:$0xff]   ;;  %v581_v27 = vld [vmem:[%s737_s0 + $0x20] sm:$0xff]   ;;  %v582_v38 = vld [vmem:[%s737_s0 + $0x28] sm:$0xff]  }
   0x3   :  { %v561_v8 = vunpack.c.h.bf16 %v579_v2  ;;  %v560_v9 = vunpack.c.l.bf16 %v579_v2  ;;  %v565_v10 = vunpack.c.h.bf16 %v580_v7  ;;  %v564_v18 = vunpack.c.l.bf16 %v580_v7  ;;  %v583_v50 = vld [vmem:[%s737_s0 + $0x30] sm:$0xff]  }
   0x4   :  { %v58_v11 = vcombine.high %v556_v3, %v556_v3  ;;  %v95_v12 = vsel %vm84_vm0, %v556_v3, 0.0  ;;  %v56_v13 = vcombine.high %v552_v4, %v552_v4  ;;  %v85_v14 = vsel %vm84_vm0, %v552_v4, 0.0 }
   0x5   :  { %v59_v15 = vcombine.high %v557_v5, %v557_v5  ;;  %v100_v16 = vsel %vm84_vm0, %v557_v5, 0.0  ;;  %v57_v17 = vcombine.high %v553_v6, %v553_v6  ;;  %v90_v21 = vsel %vm84_vm0, %v553_v6, 0.0 }
   0x6   :  { %v96_v19 = vsel %vm84_vm0, %v58_v11, 0.0  ;;  %v86_v20 = vsel %vm84_vm0, %v56_v13, 0.0  ;;  %v61_v22 = vcombine.high %v561_v8, %v561_v8  ;;  %v110_v28 = vsel %vm84_vm0, %v561_v8, 0.0  ;;  %v155_v13 = vld [vmem:[%s738_s1] sm:$0xff] }
   0x7   :  { %v97_v23 = vadd.f32 %v96_v19, %v95_v12  ;;  %v87_v24 = vadd.f32 %v86_v20, %v85_v14  ;;  %v101_v25 = vsel %vm84_vm0, %v59_v15, 0.0  ;;  %v91_v26 = vsel %vm84_vm0, %v57_v17, 0.0  ;;  %v156_v14 = vld [vmem:[%s738_s1 + $0x8] sm:$0xff] }
   0x8   :  { %v60_v29 = vcombine.high %v560_v9, %v560_v9  ;;  %v102_v30 = vadd.f32 %v101_v25, %v100_v16  ;;  %v92_v31 = vadd.f32 %v91_v26, %v90_v21  ;;  %v111_v32 = vsel %vm84_vm0, %v61_v22, 0.0 }
   0x9   :  { %98 = vadd.xlane.f32.xlu1 %v97_v23  ;;  %88 = vadd.xlane.f32.xlu0 %v87_v24  ;;  %v63_v33 = vcombine.high %v565_v10, %v565_v10  ;;  %v105_v34 = vsel %vm84_vm0, %v560_v9, 0.0  ;;  %v62_v36 = vcombine.high %v564_v18, %v564_v18  ;;  %v569_v37 = vunpack.c.h.bf16 %v581_v27 }
   0xa   :  { %v106_v35 = vsel %vm84_vm0, %v60_v29, 0.0  ;;  %v568_v39 = vunpack.c.l.bf16 %v581_v27  ;;  %v112_v40 = vadd.f32 %v111_v32, %v110_v28  ;;  %v120_v41 = vsel %vm84_vm0, %v565_v10, 0.0 }
   0xb   :  { %v107_v42 = vadd.f32 %v106_v35, %v105_v34  ;;  %v121_v43 = vsel %vm84_vm0, %v63_v33, 0.0  ;;  %v65_v44 = vcombine.high %v569_v37, %v569_v37  ;;  %v572_v45 = vunpack.c.l.bf16 %v582_v38 }
   0xc   :  { %v115_v46 = vsel %vm84_vm0, %v564_v18, 0.0  ;;  %v116_v47 = vsel %vm84_vm0, %v62_v36, 0.0  ;;  %v64_v48 = vcombine.high %v568_v39, %v568_v39  ;;  %v573_v49 = vunpack.c.h.bf16 %v582_v38  ;;  %v157_v18 = vld [vmem:[%s738_s1 + $0x10] sm:$0xf] }
   0xd   :  { %103 = vadd.xlane.f32.xlu1 %v102_v30  ;;  %93 = vadd.xlane.f32.xlu0 %v92_v31  ;;  %v122_v51 = vadd.f32 %v121_v43, %v120_v41  ;;  %v130_v52 = vsel %vm84_vm0, %v569_v37, 0.0  ;;  %v117_v53 = vadd.f32 %v116_v47, %v115_v46  ;;  %v131_v54 = vsel %vm84_vm0, %v65_v44, 0.0 }
   0xe   :  { %v125_v55 = vsel %vm84_vm0, %v568_v39, 0.0  ;;  %v66_v56 = vcombine.high %v572_v45, %v572_v45  ;;  %v126_v57 = vsel %vm84_vm0, %v64_v48, 0.0  ;;  %v67_v58 = vcombine.high %v573_v49, %v573_v49 }
   0xf   :  { %v576_v59 = vunpack.c.l.bf16 %v583_v50  ;;  %v577_v60 = vunpack.c.h.bf16 %v583_v50  ;;  %v132_v61 = vadd.f32 %v131_v54, %v130_v52  ;;  %v127_v62 = vadd.f32 %v126_v57, %v125_v55 }
  0x10   :  { %v135_v63 = vsel %vm84_vm0, %v572_v45, 0.0  ;;  %v136_v0 = vsel %vm84_vm0, %v66_v56, 0.0  ;;  %v140_v1 = vsel %vm84_vm0, %v573_v49, 0.0  ;;  %v141_v2 = vsel %vm84_vm0, %v67_v58, 0.0 }
  0x11   :  { %113 = vadd.xlane.f32.xlu1 %v112_v40  ;;  %108 = vadd.xlane.f32.xlu0 %v107_v42  ;;  %v68_v3 = vcombine.high %v576_v59, %v576_v59  ;;  %v69_v4 = vcombine.high %v577_v60, %v577_v60  ;;  %v137_v5 = vadd.f32 %v136_v0, %v135_v63  ;;  %v145_v7 = vsel %vm84_vm0, %v576_v59, 0.0 }
  0x12   :  { %v142_v6 = vadd.f32 %v141_v2, %v140_v1  ;;  %v150_v9 = vsel %vm84_vm0, %v577_v60, 0.0  ;;  %v279_v15 = vcombine.high %v155_v13, %v155_v13  ;;  %v280_v16 = vcombine.high %v156_v14, %v156_v14  ;;  %v158_v1 = vld [vmem:[%s739_s2] sm:$0x1f] }
  0x13   :  { %v146_v8 = vsel %vm84_vm0, %v68_v3, 0.0  ;;  %v151_v10 = vsel %vm84_vm0, %v69_v4, 0.0  ;;  %v595_v17 = vmov 0.0   ;;  %v160_v19 = vlaneseq }
  0x14   :  { %v147_v11 = vadd.f32 %v146_v8, %v145_v7  ;;  %v152_v12 = vadd.f32 %v151_v10, %v150_v9  ;;  %539 = vmatprep.subr.msk.mxu0 %vm84_vm0, %v279_v15  ;;  %543 = vmatprep.subr.msk.mxu1 %vm84_vm0, %v280_v16  ;;  %vm269_vm7 = vcmask 1047559   ;;  %vm281_vm8 = vcmask 31744  }
  0x15   :  { %123 = vadd.xlane.f32.xlu1 %v122_v51  ;;  %118 = vadd.xlane.f32.xlu0 %v117_v53  ;;  %v679_v20 = vshrl.u32 %v160_v19, 7  ;;  %v200_v21 = vand.u32 127, %v160_v19 }
  0x16   :  { %540 = vmatpush1.msk.msra.mxu0 %vm84_vm0, %v155_v13  ;;  %360 = vmatprep.mubr.f32.mxu0 %v595_v17 }
  0x17   :  { %544 = vmatpush1.msk.msra.mxu1 %vm84_vm0, %v156_v14  ;;  %437 = vmatprep.mubr.f32.mxu1 %v595_v17  ;;  %v203_v24 = vsub.s32 %v200_v21, %v679_v20  ;;  %v162_v63 = vsub.s32 0, %v679_v20  ;;  %v170_v0 = vsub.s32 2, %v679_v20  ;;  %v166_v2 = vsub.s32 1, %v679_v20 }
  0x18   :  { %587 = vmatprep.subr.msk.mxu0 %vm84_vm0, %v157_v18  ;;  %v174_v3 = vsub.s32 3, %v679_v20  ;;  %v178_v16 = vsub.s32 4, %v679_v20 }
  0x19   :  { %133 = vadd.xlane.f32.xlu1 %v132_v61  ;;  %128 = vadd.xlane.f32.xlu0 %v127_v62  ;;  %v163_v4 = vrot.slane %v158_v1, %v162_v63 }
  0x1a   :  { %v175_v7 = vrot.slane %v158_v1, %v174_v3 }
  0x1d   :  { %138 = vadd.xlane.f32.xlu0 %v137_v5  ;;  %143 = vadd.xlane.f32.xlu1 %v142_v6  ;;  %v171_v5 = vrot.slane %v158_v1, %v170_v0  ;;  %v167_v6 = vrot.slane %v158_v1, %v166_v2 }
  0x21   :  { %148 = vadd.xlane.f32.xlu0 %v147_v11  ;;  %153 = vadd.xlane.f32.xlu1 %v152_v12 }
  0x96   :  { %v99_v22 = vpop.xlane.xlu1 %98  ;;  %v89_v23 = vpop.xlane.xlu0 %88 }
  0x97   :  { %v204_v27 = vrot.slane %v89_v23, %v203_v24  ;;  %v212_v30 = vrot.slane %v99_v22, %v203_v24 }
  0x9a   :  { %v104_v25 = vpop.xlane.xlu1 %103  ;;  %v94_v26 = vpop.xlane.xlu0 %93 }
  0x9b   :  { %v216_v28 = vrot.slane %v104_v25, %v203_v24  ;;  %v208_v29 = vrot.slane %v94_v26, %v203_v24 }
  0x9d   :  { %v258_v31 = vsel %vm257_vm1, %v208_v29, %v204_v27 }
  0x9e   :  { %v260_v32 = vsel %vm259_vm2, %v212_v30, %v258_v31  ;;  %v114_v33 = vpop.xlane.xlu1 %113  ;;  %v109_v34 = vpop.xlane.xlu0 %108 }
  0x9f   :  { %v262_v35 = vsel %vm261_vm3, %v216_v28, %v260_v32  ;;  %v220_v36 = vrot.slane %v109_v34, %v203_v24  ;;  %v224_v37 = vrot.slane %v114_v33, %v203_v24 }
  0xa1   :  { %v264_v38 = vsel %vm263_vm4, %v220_v36, %v262_v35 }
  0xa2   :  { %v124_v39 = vpop.xlane.xlu1 %123  ;;  %v119_v40 = vpop.xlane.xlu0 %118  ;;  %v266_v43 = vsel %vm265_vm5, %v224_v37, %v264_v38 }
  0xa3   :  { %v232_v41 = vrot.slane %v124_v39, %v203_v24  ;;  %v228_v42 = vrot.slane %v119_v40, %v203_v24 }
  0xa5   :  { %v268_v44 = vsel %vm267_vm6, %v228_v42, %v266_v43 }
  0xa6   :  { %v134_v45 = vpop.xlane.xlu1 %133  ;;  %v129_v46 = vpop.xlane.xlu0 %128  ;;  %v270_v47 = vsel %vm269_vm7, %v232_v41, %v268_v44 }
  0xa7   :  { %541 = vmatmul.mubr.msk.f32.vlgmr.msra.gmra.mrb[0].mxu0 %vm281_vm8, %v270_v47  ;;  %545 = vmatmul.mubr.msk.f32.vlgmr.msra.gmra.mrb[0].mxu1 %vm281_vm8, %v270_v47  ;;  %v240_v48 = vrot.slane %v134_v45, %v203_v24  ;;  %v236_v49 = vrot.slane %v129_v46, %v203_v24 }
  0xa8   :  { %588 = vmatpush3.msk.msra.mxu0 %vm84_vm0, %v157_v18  ;;  %366 = vmatprep.mubr.f32.mxu0 %v595_v17 }
  0xa9   :  { %443 = vmatprep.mubr.f32.mxu1 %v595_v17  ;;  %v271_v53 = vsel %vm257_vm1, %v240_v48, %v236_v49 }
  0xaa   :  { %v139_v50 = vpop.xlane.xlu0 %138  ;;  %v144_v51 = vpop.xlane.xlu1 %143 }
  0xab   :  { %v244_v52 = vrot.slane %v139_v50, %v203_v24  ;;  %v248_v54 = vrot.slane %v144_v51, %v203_v24 }
  0xad   :  { %v272_v55 = vsel %vm259_vm2, %v244_v52, %v271_v53 }
  0xae   :  { %v149_v56 = vpop.xlane.xlu0 %148  ;;  %v154_v57 = vpop.xlane.xlu1 %153  ;;  %v273_v60 = vsel %vm261_vm3, %v248_v54, %v272_v55 }
  0xaf   :  { %v252_v58 = vrot.slane %v149_v56, %v203_v24  ;;  %v256_v59 = vrot.slane %v154_v57, %v203_v24  ;;  %v179_v24 = vrot.slane %v158_v1, %v178_v16 }
  0xb1   :  { %v274_v61 = vsel %vm263_vm4, %v252_v58, %v273_v60 }
  0xb2   :  { %v275_v62 = vsel %vm265_vm5, %v256_v59, %v274_v61 }
  0xb3   :  { %542 = vmatmul.mubr.msk.f32.gmra.mrb[2].mxu0 %vm281_vm8, %v275_v62  ;;  %546 = vmatmul.mubr.msk.f32.gmra.mrb[2].mxu1 %vm281_vm8, %v275_v62 }
  0xb4   :  { %589 = vmatprep.mubr.msk.f32.mxu0 %vm281_vm8, %v270_v47 }
  0xb7   :  { %590 = vmatmul.mubr.msk.f32.vlgmr.msra.gmra.mrb[4].mxu0 %vm281_vm8, %v275_v62 }
 0x17a   :  { %v362_v8 = vpop.f32.mrb[0].mxu0  ;;  %v439_v9 = vpop.f32.mrb[0].mxu1 }
 0x17b   :  { %v363_v10 = vadd.f32 %v362_v8, %v163_v4  ;;  %v440_v11 = vadd.f32 %v439_v9, %v171_v5  ;;  %v364_v12 = vpop.f32.mrb[1].mxu0  ;;  %v441_v13 = vpop.f32.mrb[1].mxu1 }
 0x17c   :  { %v365_v14 = vadd.f32 %v364_v12, %v167_v6  ;;  %v442_v15 = vadd.f32 %v441_v13, %v175_v7 }
 0x17d   :  { %525 = vst [vmem:[%s740_s3] sm:$0xff] %v363_v10  ;;  %527 = vst [vmem:[%s740_s3 + $0x10] sm:$0xff] %v440_v11 }
 0x17e   :  { %526 = vst [vmem:[%s740_s3 + $0x8] sm:$0xff] %v365_v14  ;;  %528 = vst [vmem:[%s740_s3 + $0x18] sm:$0xff] %v442_v15 }
 0x186   :  { %v368_v17 = vpop.f32.mrb[2].mxu0  ;;  %v445_v18 = vpop.f32.mrb[2].mxu1 }
 0x187   :  { %v369_v19 = vadd.f32 %v368_v17, %v163_v4  ;;  %v446_v21 = vadd.f32 %v445_v18, %v171_v5  ;;  %v370_v22 = vpop.f32.mrb[3].mxu0  ;;  %v447_v23 = vpop.f32.mrb[3].mxu1 }
 0x188   :  { %v371_v25 = vadd.f32 %v370_v22, %v167_v6  ;;  %v448_v26 = vadd.f32 %v447_v23, %v175_v7 }
 0x189   :  { %530 = vst [vmem:[%s740_s3 + $0x28] sm:$0x3f] %v369_v19  ;;  %532 = vst [vmem:[%s740_s3 + $0x38] sm:$0x3f] %v446_v21 }
 0x18a   :  { %531 = vst [vmem:[%s740_s3 + $0x30] sm:$0x3f] %v371_v25  ;;  %533 = vst [vmem:[%s740_s3 + $0x40] sm:$0x3f] %v448_v26  ;;  %v591_v20 = vpop.f32.mrb[4].mxu0 }
 0x18b   :  { %v522_v27 = vadd.f32 %v591_v20, %v179_v24  ;;  %v516_v28 = vpop.f32.mrb[5].mxu0 }
 0x18c   :  { %v517_v29 = vadd.f32 %v516_v28, %v179_v24 }
 0x18d   :  { %534 = vst [vmem:[%s740_s3 + $0x48] sm:$0x3f] %v522_v27 }
 0x18e   :  { %529 = vst [vmem:[%s740_s3 + $0x20] sm:$0xff] %v517_v29 }

// kernel: mcn_forward.3
= control target key start
LH: loop header
LB: loop body
LE: loop exit
PB: predicated region body
PF: predicated region fallthrough
CT: control target
= control target key end

     0   :  { %vm82_vm0 = vcmask 1045504   ;;  %vm3624_vm1 = vmmov 1   ;;  %v5229_v3 = vmov 0.0   ;;  %vm60_vm3 = vcmask 113664   ;;  %s5216_s0 = inlined_call_operand.vmem [shape: f32[14,640], index: 0, kind: input, shape index: {}]   ;;  %s5217_s2 = inlined_call_operand.vmem [shape: f32[56,14], index: 2, kind: input, shape index: {}]   ;;  %s5218_s3 = inlined_call_operand.vmem [shape: f32[56,14], index: 3, kind: input, shape index: {}]   ;;  %s5219_s4 = inlined_call_operand.vmem [shape: f32[640,4], index: 4, kind: input, shape index: {}]   ;;  %s5220_s1 = inlined_call_operand.vmem [shape: f32[56,640], index: 1, kind: input, shape index: {}]   ;;  %s5221_s5 = inlined_call_operand.vmem [shape: f32[4,112], index: 5, kind: input, shape index: {}]   ;;  %s5222_s8 = inlined_call_operand.vmem [shape: f32[112,128], index: 8, kind: input, shape index: {}]   ;;  %s5223_s6 = inlined_call_operand.vmem [shape: f32[56,112], index: 6, kind: input, shape index: {}]   ;;  %s5224_s7 = inlined_call_operand.vmem [shape: f32[2,56], index: 7, kind: input, shape index: {}]   ;;  %s5225_s10 = inlined_call_operand.vmem [shape: f32[128,1], index: 10, kind: input, shape index: {}]   ;;  %s5226_s11 = inlined_call_operand.<no memory space> [shape: f32[1,1], index: 11, kind: input, shape index: {}]   ;;  %s5227_s9 = inlined_call_operand.vmem [shape: f32[1,128], index: 9, kind: input, shape index: {}]   ;;  %s5228_s12 = inlined_call_operand.vmem [shape: f32[2,1], index: 12, kind: output, shape index: {}]  }
   0x1   :  { %v44_v0 = vld [vmem:[%s5216_s0 + $0x8] sm:$0xff]  ;;  %v49_v1 = vld [vmem:[%s5216_s0 + $0x30] sm:$0x3f]  ;;  %vm3699_vm2 = vmpackc.low %vm82_vm0, %vm3624_vm1  ;;  %162 = vmatprep.mubr.f32.mxu0 %v5229_v3  ;;  %287 = vmatprep.mubr.f32.mxu1 %v5229_v3  ;;  %v5231_v18 = vmov 0.0|0.0   ;;  %vm3627_vm4 = vmmov 0   ;;  %vm2009_vm5 = vcmask 1043456  }
   0x2   :  { %v3236_v4 = vpack.c.bf16 %v49_v1, %v44_v0  ;;  %v46_v5 = vld [vmem:[%s5216_s0 + $0x18] sm:$0xff]  ;;  %v51_v6 = vld [vmem:[%s5216_s0 + $0x40] sm:$0x3f]  ;;  %v48_v9 = vld [vmem:[%s5216_s0 + $0x28] sm:$0x3f]  ;;  %vm1987_vm6 = vcmask 31744  }
   0x3   :  { %v43_v7 = vld [vmem:[%s5216_s0] sm:$0xff]  ;;  %v3714_v8 = vpack.c.bf16 %v51_v6, %v46_v5  ;;  %v45_v10 = vld [vmem:[%s5216_s0 + $0x10] sm:$0xff]  ;;  %v50_v11 = vld [vmem:[%s5216_s0 + $0x38] sm:$0x3f]  ;;  %vm2128_vm7 = vcmask 457728   ;;  %vm2223_vm8 = vcmask 916480  }
   0x4   :  { %3238 = vmatprep.subr.msk.bf16.mxu0 %vm3699_vm2, %v3236_v4  ;;  %v3239_v12 = vpack.c.bf16 %v48_v9, %v43_v7  ;;  %v3727_v13 = vpack.c.bf16 %v50_v11, %v45_v10  ;;  %v3740_v14 = vld [vmem:[%s5217_s2] sm:$0xff]  ;;  %v3745_v15 = vld [vmem:[%s5217_s2 + $0x18] sm:$0xff]  ;;  %v3761_v16 = vld [vmem:[%s5217_s2 + $0x8] sm:$0xff]  ;;  %vm2397_vm9 = vcmask 1024  }
   0x5   :  { %3586 = vmatprep.subr.msk.bf16.mxu1 %vm3699_vm2, %v3714_v8  ;;  %v3766_v17 = vld [vmem:[%s5217_s2 + $0x20] sm:$0xff]  ;;  %v3784_v19 = vld [vmem:[%s5217_s2 + $0x10] sm:$0xff]  ;;  %v3789_v20 = vld [vmem:[%s5217_s2 + $0x28] sm:$0xff] }
   0x6   :  { %3241 = vmatpush1.bf16.msk.msra.mxu0 %vm3699_vm2, %v3239_v12  ;;  %3587 = vmatpush1.bf16.msk.msra.mxu1 %vm3699_vm2, %v3727_v13  ;;  %v3800_v21 = vld [vmem:[%s5217_s2 + $0x30] sm:$0xff]  ;;  %v3811_v22 = vld [vmem:[%s5218_s3] sm:$0xff]  ;;  %v52_v24 = vld [vmem:[%s5216_s0 + $0x48] sm:$0x3f] }
   0x7   :  { %3244 = vmatprep.subr.msk.bf16.mxu0 %vm3699_vm2, %v3714_v8  ;;  %3254 = vmatprep.subr.msk.bf16.mxu1 %vm3699_vm2, %v3236_v4  ;;  %v47_v23 = vld [vmem:[%s5216_s0 + $0x20] sm:$0xff]  ;;  %v3828_v26 = vld [vmem:[%s5218_s3 + $0x8] sm:$0xff]  ;;  %v3841_v27 = vld [vmem:[%s5218_s3 + $0x10] sm:$0xff] }
   0x8   :  { %v3249_v25 = vpack.c.bf16 %v52_v24, %v47_v23  ;;  %v3852_v28 = vld [vmem:[%s5218_s3 + $0x18] sm:$0xff]  ;;  %v3863_v29 = vld [vmem:[%s5218_s3 + $0x20] sm:$0xff]  ;;  %v3879_v30 = vld [vmem:[%s5218_s3 + $0x28] sm:$0xff] }
   0x9   :  { %2405 = vmatmul.mubr.msk.f32.vlgmr.msra.gmra.mrb[0].mxu0 %vm60_vm3, %v3740_v14  ;;  %2417 = vmatmul.mubr.msk.f32.vlgmr.msra.gmra.mrb[0].mxu1 %vm60_vm3, %v3745_v15  ;;  %v875_v31 = vld [vmem:[%s5219_s4 + $0x80] sm:$0xff]  ;;  %v876_v32 = vld [vmem:[%s5219_s4 + $0x88] sm:$0xff]  ;;  %v3897_v33 = vld [vmem:[%s5218_s3 + $0x30] sm:$0xff] }
   0xa   :  { %168 = vmatprep.mubr.f32.mxu0 %v5229_v3  ;;  %293 = vmatprep.mubr.f32.mxu1 %v5229_v3  ;;  %v3899_v34 = vpack.c.bf16 %v876_v32, %v875_v31  ;;  %v859_v35 = vld [vmem:[%s5219_s4] sm:$0xff]  ;;  %v860_v36 = vld [vmem:[%s5219_s4 + $0x8] sm:$0xff]  ;;  %v877_v37 = vld [vmem:[%s5219_s4 + $0x90] sm:$0xff] }
   0xb   :  { %3247 = vmatpush1.bf16.msk.msra.mxu0 %vm3699_vm2, %v3727_v13  ;;  %3257 = vmatpush1.bf16.msk.msra.mxu1 %vm3699_vm2, %v3239_v12  ;;  %v878_v38 = vld [vmem:[%s5219_s4 + $0x98] sm:$0xff]  ;;  %v3972_v39 = vpack.c.bf16 %v860_v36, %v859_v35  ;;  %v861_v41 = vld [vmem:[%s5219_s4 + $0x10] sm:$0xff]  ;;  %v879_v43 = vld [vmem:[%s5219_s4 + $0xa0] sm:$0xff] }
   0xc   :  { %3248 = vmatprep.subr.bf16.mxu0 %v5231_v18  ;;  %3264 = vmatprep.subr.bf16.mxu1 %v5231_v18  ;;  %v3974_v40 = vpack.c.bf16 %v878_v38, %v877_v37  ;;  %v862_v42 = vld [vmem:[%s5219_s4 + $0x18] sm:$0xff]  ;;  %v880_v44 = vld [vmem:[%s5219_s4 + $0xa8] sm:$0xff]  ;;  %v863_v47 = vld [vmem:[%s5219_s4 + $0x20] sm:$0xff] }
   0xd   :  { %2406 = vmatmul.mubr.msk.f32.gmra.mrb[2].mxu0 %vm60_vm3, %v3761_v16  ;;  %2418 = vmatmul.mubr.msk.f32.gmra.mrb[2].mxu1 %vm60_vm3, %v3766_v17  ;;  %v3994_v45 = vpack.c.bf16 %v862_v42, %v861_v41  ;;  %v3997_v46 = vpack.c.bf16 %v880_v44, %v879_v43  ;;  %v864_v48 = vld [vmem:[%s5219_s4 + $0x28] sm:$0xff]  ;;  %v881_v50 = vld [vmem:[%s5219_s4 + $0xb0] sm:$0xff]  ;;  %v882_v51 = vld [vmem:[%s5219_s4 + $0xb8] sm:$0xff] }
   0xe   :  { %174 = vmatprep.mubr.f32.mxu0 %v5229_v3  ;;  %299 = vmatprep.mubr.f32.mxu1 %v5229_v3  ;;  %v4009_v49 = vpack.c.bf16 %v864_v48, %v863_v47  ;;  %v4025_v52 = vpack.c.bf16 %v882_v51, %v881_v50  ;;  %v865_v53 = vld [vmem:[%s5219_s4 + $0x30] sm:$0xff]  ;;  %v866_v54 = vld [vmem:[%s5219_s4 + $0x38] sm:$0xff]  ;;  %v883_v56 = vld [vmem:[%s5219_s4 + $0xc0] sm:$0xff] }
   0xf   :  { %v4035_v55 = vpack.c.bf16 %v866_v54, %v865_v53  ;;  %v884_v57 = vld [vmem:[%s5219_s4 + $0xc8] sm:$0xff]  ;;  %v867_v59 = vld [vmem:[%s5219_s4 + $0x40] sm:$0xff]  ;;  %v885_v62 = vld [vmem:[%s5219_s4 + $0xd0] sm:$0xff] }
  0x10   :  { %v4046_v58 = vpack.c.bf16 %v884_v57, %v883_v56  ;;  %v868_v60 = vld [vmem:[%s5219_s4 + $0x48] sm:$0xff]  ;;  %v886_v63 = vld [vmem:[%s5219_s4 + $0xd8] sm:$0xff]  ;;  %v869_v1 = vld [vmem:[%s5219_s4 + $0x50] sm:$0xff] }
  0x11   :  { %2407 = vmatmul.mubr.msk.f32.gmra.mrb[4].mxu0 %vm60_vm3, %v3784_v19  ;;  %2419 = vmatmul.mubr.msk.f32.gmra.mrb[4].mxu1 %vm60_vm3, %v3789_v20  ;;  %v4056_v61 = vpack.c.bf16 %v868_v60, %v867_v59  ;;  %v4067_v0 = vpack.c.bf16 %v886_v63, %v885_v62  ;;  %v870_v2 = vld [vmem:[%s5219_s4 + $0x58] sm:$0xff]  ;;  %v887_v5 = vld [vmem:[%s5219_s4 + $0xe0] sm:$0xff]  ;;  %v888_v6 = vld [vmem:[%s5219_s4 + $0xe8] sm:$0xff] }
  0x12   :  { %180 = vmatprep.mubr.f32.mxu0 %v5229_v3  ;;  %305 = vmatprep.mubr.f32.mxu1 %v5229_v3  ;;  %v4077_v4 = vpack.c.bf16 %v870_v2, %v869_v1  ;;  %v4087_v7 = vpack.c.bf16 %v888_v6, %v887_v5  ;;  %v872_v9 = vld [vmem:[%s5219_s4 + $0x68] sm:$0xff]  ;;  %v889_v11 = vld [vmem:[%s5219_s4 + $0xf0] sm:$0xff]  ;;  %v890_v12 = vld [vmem:[%s5219_s4 + $0xf8] sm:$0xff] }
  0x13   :  { %5306 = vst [vmem:[#allocation3_spill] sm:$0xff] %v4056_v61  ;;  %5307 = vst [vmem:[#allocation4_spill] sm:$0xff] %v4067_v0  ;;  %v909_v24 = vld [vmem:[%s5219_s4 + $0x190] sm:$0xff]  ;;  %v912_v31 = vld [vmem:[%s5219_s4 + $0x1a8] sm:$0xff] }
  0x14   :  { %5308 = vst [vmem:[#allocation5_spill] sm:$0xff] %v4077_v4  ;;  %5309 = vst [vmem:[#allocation6_spill] sm:$0xff] %v4087_v7  ;;  %v896_v35 = vld [vmem:[%s5219_s4 + $0x128] sm:$0xff]  ;;  %v913_v37 = vld [vmem:[%s5219_s4 + $0x1b0] sm:$0xff] }
  0x15   :  { %2408 = vmatmul.mubr.msk.f32.gmra.mrb[6].mxu0 %vm60_vm3, %v3745_v15  ;;  %2420 = vmatmul.mubr.msk.f32.gmra.mrb[6].mxu1 %vm60_vm3, %v3800_v21  ;;  %v914_v38 = vld [vmem:[%s5219_s4 + $0x1b8] sm:$0xff]  ;;  %v897_v42 = vld [vmem:[%s5219_s4 + $0x130] sm:$0xff]  ;;  %v915_v47 = vld [vmem:[%s5219_s4 + $0x1c0] sm:$0xff] }
  0x16   :  { %186 = vmatprep.mubr.f32.mxu0 %v5229_v3  ;;  %504 = vmatprep.mubr.f32.mxu1 %v5229_v3  ;;  %v4178_v41 = vpack.c.bf16 %v914_v38, %v913_v37  ;;  %v898_v43 = vld [vmem:[%s5219_s4 + $0x138] sm:$0xff]  ;;  %v916_v48 = vld [vmem:[%s5219_s4 + $0x1c8] sm:$0xff]  ;;  %v899_v51 = vld [vmem:[%s5219_s4 + $0x140] sm:$0xff] }
  0x17   :  { %v4186_v44 = vpack.c.bf16 %v898_v43, %v897_v42  ;;  %v4196_v50 = vpack.c.bf16 %v916_v48, %v915_v47  ;;  %v900_v53 = vld [vmem:[%s5219_s4 + $0x148] sm:$0xff]  ;;  %v917_v56 = vld [vmem:[%s5219_s4 + $0x1d0] sm:$0xff]  ;;  %v918_v57 = vld [vmem:[%s5219_s4 + $0x1d8] sm:$0xff] }
  0x18   :  { %5314 = vst [vmem:[#allocation11_spill] sm:$0xff] %v4178_v41  ;;  %v4204_v54 = vpack.c.bf16 %v900_v53, %v899_v51  ;;  %v4214_v59 = vpack.c.bf16 %v918_v57, %v917_v56  ;;  %v901_v60 = vld [vmem:[%s5219_s4 + $0x150] sm:$0xff]  ;;  %v902_v62 = vld [vmem:[%s5219_s4 + $0x158] sm:$0xff]  ;;  %v919_v1 = vld [vmem:[%s5219_s4 + $0x1e0] sm:$0xff] }
  0x19   :  { %2409 = vmatmul.mubr.msk.f32.gmra.mrb[8].mxu0 %vm60_vm3, %v3766_v17  ;;  %2431 = vmatmul.mubr.msk.f32.vlgmr.msra.gmra.mrb[8].mxu1 %vm60_vm3, %v3811_v22  ;;  %5315 = vst [vmem:[#allocation12_spill] sm:$0xff] %v4186_v44  ;;  %v4222_v63 = vpack.c.bf16 %v902_v62, %v901_v60  ;;  %v920_v2 = vld [vmem:[%s5219_s4 + $0x1e8] sm:$0xff]  ;;  %v903_v6 = vld [vmem:[%s5219_s4 + $0x160] sm:$0xff]  ;;  %v4298_v51 = vld [vmem:[%s5220_s1 + $0xd8] sm:$0xff] }
  0x1a   :  { %192 = vmatprep.mubr.f32.mxu0 %v5229_v3  ;;  %510 = vmatprep.mubr.f32.mxu1 %v5229_v3  ;;  %v4232_v5 = vpack.c.bf16 %v920_v2, %v919_v1  ;;  %v4303_v53 = vld [vmem:[%s5220_s1 + $0xe0] sm:$0xff] }
  0x1b   :  { %3267 = vmatpush3.bf16.msk.msra.mxu1 %vm3699_vm2, %v3249_v25 }
  0x1d   :  { %2410 = vmatmul.mubr.msk.f32.gmra.mrb[10].mxu0 %vm60_vm3, %v3789_v20  ;;  %2432 = vmatmul.mubr.msk.f32.gmra.mrb[10].mxu1 %vm60_vm3, %v3828_v26 }
  0x1e   :  { %198 = vmatprep.mubr.f32.mxu0 %v5229_v3  ;;  %516 = vmatprep.mubr.f32.mxu1 %v5229_v3 }
  0x21   :  { %2411 = vmatmul.mubr.msk.f32.gmra.mrb[12].mxu0 %vm60_vm3, %v3800_v21  ;;  %2433 = vmatmul.mubr.msk.f32.gmra.mrb[12].mxu1 %vm60_vm3, %v3841_v27 }
  0x22   :  { %269 = vmatprep.mubr.f32.mxu0 %v5229_v3  ;;  %522 = vmatprep.mubr.f32.mxu1 %v5229_v3 }
  0x25   :  { %2414 = vmatmul.mubr.msk.f32.vlgmr.msra.gmra.mrb[14].mxu0 %vm60_vm3, %v3740_v14  ;;  %2434 = vmatmul.mubr.msk.f32.gmra.mrb[14].mxu1 %vm60_vm3, %v3852_v28 }
  0x26   :  { %275 = vmatprep.mubr.f32.mxu0 %v5229_v3  ;;  %528 = vmatprep.mubr.f32.mxu1 %v5229_v3 }
  0x27   :  { %3251 = vmatpush3.bf16.msk.msra.mxu0 %vm3699_vm2, %v3249_v25  ;;  %v910_v25 = vld [vmem:[%s5219_s4 + $0x198] sm:$0xff] }
  0x28   :  { %3260 = vmatprep.subr.msk.bf16.mxu0 %vm3699_vm2, %v3714_v8  ;;  %v871_v8 = vld [vmem:[%s5219_s4 + $0x60] sm:$0xff] }
  0x29   :  { %2415 = vmatmul.mubr.msk.f32.gmra.mrb[16].mxu0 %vm60_vm3, %v3761_v16  ;;  %2435 = vmatmul.mubr.msk.f32.gmra.mrb[16].mxu1 %vm60_vm3, %v3863_v29  ;;  %v4096_v10 = vpack.c.bf16 %v872_v9, %v871_v8  ;;  %v904_v8 = vld [vmem:[%s5219_s4 + $0x168] sm:$0xff] }
  0x2a   :  { %281 = vmatprep.mubr.f32.mxu0 %v5229_v3  ;;  %534 = vmatprep.mubr.f32.mxu1 %v5229_v3  ;;  %v4240_v9 = vpack.c.bf16 %v904_v8, %v903_v6  ;;  %v4314_v6 = vld [vmem:[%s5220_s1 + $0x100] sm:$0xff]  ;;  %v4319_v8 = vld [vmem:[%s5220_s1 + $0x108] sm:$0xff] }
  0x2b   :  { %5310 = vst [vmem:[#allocation7_spill] sm:$0xff] %v4096_v10  ;;  %5317 = vst [vmem:[#allocation14_spill] sm:$0xff] %v4314_v6 }
  0x2c   :  { %5318 = vst [vmem:[#allocation15_spill] sm:$0xff] %v4319_v8 }
  0x2d   :  { %2416 = vmatmul.mubr.msk.f32.gmra.mrb[18].mxu0 %vm60_vm3, %v3784_v19  ;;  %2436 = vmatmul.mubr.msk.f32.gmra.mrb[18].mxu1 %vm60_vm3, %v3879_v30 }
  0x2e   :  { %2925 = vmatprep.mubr.msk.f32.mxu0 %vm3627_vm4, %v5229_v3  ;;  %540 = vmatprep.mubr.f32.mxu1 %v5229_v3 }
  0x31   :  { %2926 = vmatmul.mubr.msk.f32.vlgmr.msra.gmra.mrb[20].mxu0 %vm60_vm3, %v3740_v14  ;;  %2437 = vmatmul.mubr.msk.f32.gmra.mrb[20].mxu1 %vm60_vm3, %v3897_v33  ;;  %v873_v14 = vld [vmem:[%s5219_s4 + $0x70] sm:$0xff] }
  0x32   :  { %2928 = vmatprep.mubr.msk.f32.mxu0 %vm3627_vm4, %v5229_v3  ;;  %2950 = vmatprep.mubr.msk.f32.mxu1 %vm3627_vm4, %v5229_v3 }
  0x33   :  { %3263 = vmatpush1.bf16.msk.msra.mxu0 %vm3699_vm2, %v3727_v13  ;;  %v4104_v13 = vpack.c.bf16 %v890_v12, %v889_v11  ;;  %v921_v11 = vld [vmem:[%s5219_s4 + $0x1f0] sm:$0xff]  ;;  %v922_v12 = vld [vmem:[%s5219_s4 + $0x1f8] sm:$0xff] }
  0x34   :  { %3269 = vmatprep.subr.bf16.mxu0 %v3899_v34 }
  0x35   :  { %2929 = vmatmul.mubr.msk.f32.gmra.mrb[22].mxu0 %vm60_vm3, %v3761_v16  ;;  %2951 = vmatmul.mubr.msk.f32.vlgmr.msra.gmra.mrb[22].mxu1 %vm60_vm3, %v3811_v22  ;;  %5311 = vst [vmem:[#allocation8_spill] sm:$0xff] %v4104_v13 }
  0x36   :  { %2931 = vmatprep.mubr.msk.f32.mxu0 %vm3627_vm4, %v5229_v3  ;;  %2953 = vmatprep.mubr.msk.f32.mxu1 %vm3627_vm4, %v5229_v3 }
  0x39   :  { %2932 = vmatmul.mubr.msk.f32.gmra.mrb[24].mxu0 %vm60_vm3, %v3784_v19  ;;  %2954 = vmatmul.mubr.msk.f32.gmra.mrb[24].mxu1 %vm60_vm3, %v3828_v26  ;;  %v908_v19 = vld [vmem:[%s5219_s4 + $0x188] sm:$0xff] }
  0x3a   :  { %2934 = vmatprep.mubr.msk.f32.mxu0 %vm3627_vm4, %v5229_v3  ;;  %2956 = vmatprep.mubr.msk.f32.mxu1 %vm3627_vm4, %v5229_v3 }
  0x3d   :  { %2935 = vmatmul.mubr.msk.f32.gmra.mrb[26].mxu0 %vm60_vm3, %v3745_v15  ;;  %2957 = vmatmul.mubr.msk.f32.gmra.mrb[26].mxu1 %vm60_vm3, %v3841_v27  ;;  %v874_v15 = vld [vmem:[%s5219_s4 + $0x78] sm:$0xff] }
  0x3e   :  { %2937 = vmatprep.mubr.msk.f32.mxu0 %vm3627_vm4, %v5229_v3  ;;  %2959 = vmatprep.mubr.msk.f32.mxu1 %vm3627_vm4, %v5229_v3  ;;  %v4114_v16 = vpack.c.bf16 %v874_v15, %v873_v14  ;;  %v4250_v14 = vpack.c.bf16 %v922_v12, %v921_v11  ;;  %v905_v15 = vld [vmem:[%s5219_s4 + $0x170] sm:$0xff] }
  0x40   :  { %5312 = vst [vmem:[#allocation9_spill] sm:$0xff] %v4114_v16 }
  0x41   :  { %2938 = vmatmul.mubr.msk.f32.gmra.mrb[28].mxu0 %vm60_vm3, %v3766_v17  ;;  %2960 = vmatmul.mubr.msk.f32.gmra.mrb[28].mxu1 %vm60_vm3, %v3852_v28  ;;  %v907_v17 = vld [vmem:[%s5219_s4 + $0x180] sm:$0xff] }
  0x42   :  { %2940 = vmatprep.mubr.msk.f32.mxu0 %vm3627_vm4, %v5229_v3  ;;  %2962 = vmatprep.mubr.msk.f32.mxu1 %vm3627_vm4, %v5229_v3 }
  0x45   :  { %2941 = vmatmul.mubr.msk.f32.gmra.mrb[30].mxu0 %vm60_vm3, %v3789_v20  ;;  %2963 = vmatmul.mubr.msk.f32.gmra.mrb[30].mxu1 %vm60_vm3, %v3863_v29  ;;  %v4124_v20 = vpack.c.bf16 %v908_v19, %v907_v17  ;;  %v906_v17 = vld [vmem:[%s5219_s4 + $0x178] sm:$0xff] }
  0x46   :  { %2943 = vmatprep.mubr.msk.f32.mxu0 %vm3627_vm4, %v5229_v3  ;;  %2965 = vmatprep.mubr.msk.f32.mxu1 %vm3627_vm4, %v5229_v3  ;;  %v4258_v19 = vpack.c.bf16 %v906_v17, %v905_v15 }
  0x47   :  { %3301 = vmatprep.subr.bf16.mxu1 %v4124_v20 }
  0x49   :  { %2944 = vmatmul.mubr.msk.f32.gmra.mrb[32].mxu0 %vm60_vm3, %v3800_v21  ;;  %2966 = vmatmul.mubr.msk.f32.gmra.mrb[32].mxu1 %vm60_vm3, %v3879_v30  ;;  %v891_v21 = vld [vmem:[%s5219_s4 + $0x100] sm:$0xff] }
  0x4a   :  { %611 = vmatprep.mubr.f32.mxu0 %v5229_v3  ;;  %2968 = vmatprep.mubr.msk.f32.mxu1 %vm3627_vm4, %v5229_v3 }
  0x4d   :  { %2440 = vmatmul.mubr.msk.f32.vlgmr.msra.gmra.mrb[34].mxu0 %vm60_vm3, %v3811_v22  ;;  %2969 = vmatmul.mubr.msk.f32.gmra.mrb[34].mxu1 %vm60_vm3, %v3897_v33  ;;  %v892_v22 = vld [vmem:[%s5219_s4 + $0x108] sm:$0xff] }
  0x4e   :  { %617 = vmatprep.mubr.f32.mxu0 %v5229_v3  ;;  %3271 = vmatpush3.bf16.msra.mxu0 %v3972_v39  ;;  %v4132_v23 = vpack.c.bf16 %v892_v22, %v891_v21  ;;  %v4266_v21 = vld [vmem:[%s5220_s1 + $0x88] sm:$0xff]  ;;  %v4271_v22 = vld [vmem:[%s5220_s1 + $0x90] sm:$0xff] }
  0x4f   :  { %3273 = vmatprep.subr.bf16.mxu0 %v3974_v40 }
  0x50   :  { %3303 = vmatpush3.bf16.msra.mxu1 %v4132_v23 }
  0x51   :  { %2441 = vmatmul.mubr.msk.f32.gmra.mrb[36].mxu0 %vm60_vm3, %v3828_v26  ;;  %v4142_v26 = vpack.c.bf16 %v910_v25, %v909_v24 }
  0x52   :  { %623 = vmatprep.mubr.f32.mxu0 %v5229_v3  ;;  %3275 = vmatpush3.bf16.msra.mxu0 %v3994_v45 }
  0x53   :  { %3277 = vmatprep.subr.bf16.mxu0 %v3997_v46  ;;  %3305 = vmatprep.subr.bf16.mxu1 %v4142_v26 }
  0x55   :  { %2442 = vmatmul.mubr.msk.f32.gmra.mrb[38].mxu0 %vm60_vm3, %v3841_v27  ;;  %v893_v27 = vld [vmem:[%s5219_s4 + $0x110] sm:$0xff] }
  0x56   :  { %629 = vmatprep.mubr.f32.mxu0 %v5229_v3  ;;  %3279 = vmatpush3.bf16.msra.mxu0 %v4009_v49 }
  0x57   :  { %3281 = vmatprep.subr.bf16.mxu0 %v4025_v52 }
  0x59   :  { %2443 = vmatmul.mubr.msk.f32.gmra.mrb[40].mxu0 %vm60_vm3, %v3852_v28  ;;  %v894_v28 = vld [vmem:[%s5219_s4 + $0x118] sm:$0xff] }
  0x5a   :  { %635 = vmatprep.mubr.f32.mxu0 %v5229_v3  ;;  %3283 = vmatpush3.bf16.msra.mxu0 %v4035_v55 }
  0x5b   :  { %3285 = vmatprep.subr.bf16.mxu0 %v4046_v58 }
  0x5d   :  { %2444 = vmatmul.mubr.msk.f32.gmra.mrb[42].mxu0 %vm60_vm3, %v3863_v29  ;;  %v4150_v29 = vpack.c.bf16 %v894_v28, %v893_v27 }
  0x5e   :  { %641 = vmatprep.mubr.f32.mxu0 %v5229_v3  ;;  %3287 = vmatpush3.bf16.msra.mxu0 %v4056_v61 }
  0x5f   :  { %3289 = vmatprep.subr.bf16.mxu0 %v4067_v0  ;;  %3307 = vmatpush3.bf16.msra.mxu1 %v4150_v29 }
  0x61   :  { %2445 = vmatmul.mubr.msk.f32.gmra.mrb[44].mxu0 %vm60_vm3, %v3879_v30  ;;  %v911_v30 = vld [vmem:[%s5219_s4 + $0x1a0] sm:$0xff] }
  0x62   :  { %647 = vmatprep.mubr.f32.mxu0 %v5229_v3  ;;  %3291 = vmatpush3.bf16.msra.mxu0 %v4077_v4  ;;  %v4160_v32 = vpack.c.bf16 %v912_v31, %v911_v30 }
  0x63   :  { %3293 = vmatprep.subr.bf16.mxu0 %v4087_v7 }
  0x64   :  { %3309 = vmatprep.subr.bf16.mxu1 %v4160_v32 }
  0x65   :  { %2446 = vmatmul.mubr.msk.f32.gmra.mrb[46].mxu0 %vm60_vm3, %v3897_v33  ;;  %v895_v33 = vld [vmem:[%s5219_s4 + $0x120] sm:$0xff] }
  0x66   :  { %3295 = vmatpush3.bf16.msra.mxu0 %v4096_v10  ;;  %v4168_v36 = vpack.c.bf16 %v896_v35, %v895_v33  ;;  %v4282_v33 = vld [vmem:[%s5220_s1 + $0xb0] sm:$0xff]  ;;  %v4287_v35 = vld [vmem:[%s5220_s1 + $0xb8] sm:$0xff] }
  0x67   :  { %3297 = vmatprep.subr.bf16.mxu0 %v4104_v13  ;;  %v923_v13 = vld [vmem:[%s5219_s4 + $0x200] sm:$0xff] }
  0x68   :  { %5313 = vst [vmem:[#allocation10_spill] sm:$0xff] %v4168_v36  ;;  %3311 = vmatpush3.bf16.msra.mxu1 %v4168_v36 }
  0x69   :  { %3313 = vmatprep.subr.bf16.mxu1 %v4178_v41 }
  0x6a   :  { %3299 = vmatpush3.bf16.msra.mxu0 %v4114_v16 }
  0x6b   :  { %3332 = vmatprep.subr.bf16.mxu0 %v5231_v18 }
  0x6c   :  { %3315 = vmatpush3.bf16.msra.mxu1 %v4186_v44 }
  0x6d   :  { %3317 = vmatprep.subr.bf16.mxu1 %v4196_v50 }
  0x70   :  { %3319 = vmatpush3.bf16.msra.mxu1 %v4204_v54 }
  0x71   :  { %3321 = vmatprep.subr.bf16.mxu1 %v4214_v59 }
  0x74   :  { %3323 = vmatpush3.bf16.msra.mxu1 %v4222_v63 }
  0x75   :  { %3325 = vmatprep.subr.bf16.mxu1 %v4232_v5 }
  0x78   :  { %3327 = vmatpush3.bf16.msra.mxu1 %v4240_v9 }
  0x79   :  { %3329 = vmatprep.subr.bf16.mxu1 %v4250_v14 }
  0x7c   :  { %3331 = vmatpush3.bf16.msra.mxu1 %v4258_v19 }
  0x7d   :  { %3357 = vmatprep.subr.bf16.mxu1 %v3899_v34 }
  0xdc   :  { %v164_v24 = vpop.f32.mrb[0].mxu0  ;;  %v289_v25 = vpop.f32.mrb[0].mxu1 }
  0xdd   :  { %v166_v27 = vpop.f32.mrb[1].mxu0  ;;  %v4274_v28 = vmul.f32 %v4266_v21, %v289_v25  ;;  %v291_v30 = vpop.f32.mrb[1].mxu1 }
  0xde   :  { %v4277_v31 = vmul.f32 %v4271_v22, %v291_v30  ;;  %v754_v30 = vld [vmem:[%s5220_s1] sm:$0xff] }
  0xdf   :  { %v4337_v3 = vmul.f32 %v754_v30, %v164_v24  ;;  %v759_v24 = vld [vmem:[%s5220_s1 + $0x28] sm:$0xff] }
  0xe0   :  { %v170_v37 = vpop.f32.mrb[2].mxu0  ;;  %v295_v38 = vpop.f32.mrb[2].mxu1 }
  0xe1   :  { %v172_v42 = vpop.f32.mrb[3].mxu0  ;;  %v4290_v43 = vmul.f32 %v4282_v33, %v295_v38  ;;  %v297_v47 = vpop.f32.mrb[3].mxu1  ;;  %5321 = vst [vmem:[#allocation18_spill] sm:$0xff] %v4337_v3 }
  0xe2   :  { %v4293_v48 = vmul.f32 %v4287_v35, %v297_v47  ;;  %v755_v47 = vld [vmem:[%s5220_s1 + $0x8] sm:$0xff] }
  0xe3   :  { %v4349_v10 = vmul.f32 %v755_v47, %v166_v27 }
  0xe4   :  { %v176_v56 = vpop.f32.mrb[4].mxu0  ;;  %v301_v57 = vpop.f32.mrb[4].mxu1 }
  0xe5   :  { %v178_v60 = vpop.f32.mrb[5].mxu0  ;;  %v4306_v62 = vmul.f32 %v4298_v51, %v301_v57  ;;  %v303_v1 = vpop.f32.mrb[5].mxu1  ;;  %5323 = vst [vmem:[#allocation20_spill] sm:$0xff] %v4349_v10 }
  0xe6   :  { %v4309_v2 = vmul.f32 %v4303_v53, %v303_v1 }
  0xe8   :  { %5316 = vst [vmem:[#allocation13_spill] sm:$0xff] %v4309_v2  ;;  %v182_v11 = vpop.f32.mrb[6].mxu0  ;;  %v307_v12 = vpop.f32.mrb[6].mxu1  ;;  %v5333_v2 = vmov 0.0|0.0  }
  0xe9   :  { %v4321_v15 = vpop.f32.mrb[7].mxu0  ;;  %v4324_v17 = vmul.f32 %v4314_v6, %v307_v12  ;;  %v309_v25 = vpop.f32.mrb[7].mxu1  ;;  %v925_v6 = vld [vmem:[%s5219_s4 + $0x210] sm:$0xff] }
  0xea   :  { %v4330_v38 = vmul.f32 %v4319_v8, %v309_v25  ;;  %v924_v25 = vld [vmem:[%s5219_s4 + $0x208] sm:$0xff]  ;;  %v4367_v8 = vmul.f32 %v759_v24, %v170_v37 }
  0xeb   :  { %5319 = vst [vmem:[#allocation16_spill] sm:$0xff] %v4324_v17  ;;  %v4365_v17 = vpack.c.bf16 %v924_v25, %v923_v13  ;;  %v764_v13 = vld [vmem:[%s5220_s1 + $0x50] sm:$0xff]  ;;  %v765_v25 = vld [vmem:[%s5220_s1 + $0x58] sm:$0xff] }
  0xec   :  { %5320 = vst [vmem:[#allocation17_spill] sm:$0xff] %v4330_v38  ;;  %v4335_v57 = vpop.f32.mrb[8].mxu0  ;;  %v506_v1 = vpop.f32.mrb[8].mxu1  ;;  %5326 = vst [vmem:[#allocation23_spill] sm:$0xff] %v4367_v8 }
  0xed   :  { %v4339_v18 = vmul.f32 %v754_v30, %v506_v1  ;;  %v4341_v12 = vpop.f32.mrb[9].mxu0  ;;  %v508_v16 = vpop.f32.mrb[9].mxu1  ;;  %v760_v30 = vld [vmem:[%s5220_s1 + $0x30] sm:$0xff]  ;;  %5325 = vst [vmem:[#allocation22_spill] sm:$0xff] %v4365_v17 }
  0xee   :  { %v4354_v7 = vmul.f32 %v755_v47, %v508_v16 }
  0xef   :  { %5322 = vst [vmem:[#allocation19_spill] sm:$0xff] %v4339_v18  ;;  %v939_v1 = vmul.f32 %v4339_v18, %v4337_v3  ;;  %v926_v18 = vld [vmem:[%s5219_s4 + $0x218] sm:$0xff] }
  0xf0   :  { %5324 = vst [vmem:[#allocation21_spill] sm:$0xff] %v4354_v7  ;;  %v940_v4 = vmul.f32 %v4354_v7, %v4349_v10  ;;  %v4363_v38 = vpop.f32.mrb[10].mxu0  ;;  %v512_v27 = vpop.f32.mrb[10].mxu1  ;;  %v4379_v7 = vmul.f32 %v760_v30, %v172_v42  ;;  %v4396_v10 = vpack.c.bf16 %v926_v18, %v925_v6 }
  0xf1   :  { %v4369_v0 = vmul.f32 %v759_v24, %v512_v27  ;;  %v4371_v16 = vpop.f32.mrb[11].mxu0  ;;  %v514_v47 = vpop.f32.mrb[11].mxu1 }
  0xf2   :  { %5328 = vst [vmem:[#allocation25_spill] sm:$0xff] %v4379_v7  ;;  %v4384_v37 = vmul.f32 %v760_v30, %v514_v47  ;;  %1038 = vmatprep.mubr.f32.mxu0 %v940_v4  ;;  %5330 = vst [vmem:[#allocation27_spill] sm:$0xff] %v4396_v10  ;;  %v4398_v30 = vmul.f32 %v764_v13, %v176_v56  ;;  %v770_v56 = vld [vmem:[%s5220_s1 + $0x80] sm:$0xff] }
  0xf3   :  { %5327 = vst [vmem:[#allocation24_spill] sm:$0xff] %v4369_v0  ;;  %v944_v24 = vmul.f32 %v4369_v0, %v4367_v8  ;;  %1039 = vmatmul.mubr.f32.vlgmr.msra.gmra.mrb[48].mxu0 %v939_v1  ;;  %v927_v1 = vld [vmem:[%s5219_s4 + $0x220] sm:$0xff]  ;;  %v928_v0 = vld [vmem:[%s5219_s4 + $0x228] sm:$0xff] }
  0xf4   :  { %5329 = vst [vmem:[#allocation26_spill] sm:$0xff] %v4384_v37  ;;  %v945_v27 = vmul.f32 %v4384_v37, %v4379_v7  ;;  %3334 = vmatpush3.bf16.msra.mxu0 %v4365_v17  ;;  %v4394_v42 = vpop.f32.mrb[12].mxu0  ;;  %v518_v3 = vpop.f32.mrb[12].mxu1  ;;  %5331 = vst [vmem:[#allocation28_spill] sm:$0xff] %v4398_v30  ;;  %v4411_v37 = vmul.f32 %v765_v25, %v178_v60  ;;  %v4428_v8 = vpack.c.bf16 %v928_v0, %v927_v1  ;;  %v775_v1 = vld [vmem:[%s5220_s1 + $0xa8] sm:$0xff] }
  0xf5   :  { %v4400_v4 = vmul.f32 %v764_v13, %v518_v3  ;;  %v4402_v47 = vpop.f32.mrb[13].mxu0  ;;  %v520_v61 = vpop.f32.mrb[13].mxu1  ;;  %3335 = vmatprep.subr.bf16.mxu0 %v5333_v2  ;;  %v769_v3 = vld [vmem:[%s5220_s1 + $0x78] sm:$0xff]  ;;  %v4444_v0 = vmul.f32 %v770_v56, %v4321_v15 }
  0xf6   :  { %5334 = vst [vmem:[#allocation30_spill] sm:$0xff] %v4411_v37  ;;  %v4416_v18 = vmul.f32 %v765_v25, %v520_v61  ;;  %1043 = vmatprep.mubr.f32.mxu0 %v945_v27  ;;  %5336 = vst [vmem:[#allocation32_spill] sm:$0xff] %v4428_v8  ;;  %v4430_v61 = vmul.f32 %v769_v3, %v182_v11  ;;  %v774_v11 = vld [vmem:[%s5220_s1 + $0xa0] sm:$0xff] }
  0xf7   :  { %5332 = vst [vmem:[#allocation29_spill] sm:$0xff] %v4400_v4  ;;  %v949_v6 = vmul.f32 %v4400_v4, %v4398_v30  ;;  %1044 = vmatmul.mubr.f32.gmra.mrb[50].mxu0 %v944_v24  ;;  %v929_v24 = vld [vmem:[%s5219_s4 + $0x230] sm:$0xff]  ;;  %v930_v4 = vld [vmem:[%s5219_s4 + $0x238] sm:$0xff]  ;;  %5339 = vst [vmem:[#allocation35_spill] sm:$0xff] %v4444_v0 }
  0xf8   :  { %5335 = vst [vmem:[#allocation31_spill] sm:$0xff] %v4416_v18  ;;  %v950_v13 = vmul.f32 %v4416_v18, %v4411_v37  ;;  %3337 = vmatpush3.bf16.msra.mxu0 %v4396_v10  ;;  %v4426_v60 = vpop.f32.mrb[14].mxu0  ;;  %v524_v17 = vpop.f32.mrb[14].mxu1  ;;  %5337 = vst [vmem:[#allocation33_spill] sm:$0xff] %v4430_v61  ;;  %v4461_v30 = vpack.c.bf16 %v930_v4, %v929_v24  ;;  %v4478_v4 = vmul.f32 %v775_v1, %v4341_v12  ;;  %v780_v24 = vld [vmem:[%s5220_s1 + $0xd0] sm:$0xff] }
  0xf9   :  { %v4432_v25 = vmul.f32 %v769_v3, %v524_v17  ;;  %v4434_v27 = vpop.f32.mrb[15].mxu0  ;;  %v526_v7 = vpop.f32.mrb[15].mxu1  ;;  %3338 = vmatprep.subr.bf16.mxu0 %v5333_v2 }
  0xfa   :  { %v4449_v17 = vmul.f32 %v770_v56, %v526_v7  ;;  %1048 = vmatprep.mubr.f32.mxu0 %v950_v13  ;;  %5341 = vst [vmem:[#allocation37_spill] sm:$0xff] %v4461_v30  ;;  %v4464_v7 = vmul.f32 %v774_v11, %v4335_v57  ;;  %5344 = vst [vmem:[#allocation40_spill] sm:$0xff] %v4478_v4 }
  0xfb   :  { %5338 = vst [vmem:[#allocation34_spill] sm:$0xff] %v4432_v25  ;;  %v954_v3 = vmul.f32 %v4432_v25, %v4430_v61  ;;  %1049 = vmatmul.mubr.f32.gmra.mrb[52].mxu0 %v949_v6  ;;  %v931_v6 = vld [vmem:[%s5219_s4 + $0x240] sm:$0xff]  ;;  %v932_v25 = vld [vmem:[%s5219_s4 + $0x248] sm:$0xff] }
  0xfc   :  { %5340 = vst [vmem:[#allocation36_spill] sm:$0xff] %v4449_v17  ;;  %v955_v18 = vmul.f32 %v4449_v17, %v4444_v0  ;;  %3340 = vmatpush3.bf16.msra.mxu0 %v4428_v8  ;;  %v4459_v15 = vpop.f32.mrb[16].mxu0  ;;  %v530_v10 = vpop.f32.mrb[16].mxu1  ;;  %5342 = vst [vmem:[#allocation38_spill] sm:$0xff] %v4464_v7  ;;  %v4495_v61 = vpack.c.bf16 %v932_v25, %v931_v6  ;;  %v4512_v25 = vmul.f32 %v780_v24, %v4371_v16  ;;  %v785_v6 = vld [vmem:[%s5220_s1 + $0xf8] sm:$0xff] }
  0xfd   :  { %v4466_v56 = vmul.f32 %v774_v11, %v530_v10  ;;  %v4468_v13 = vpop.f32.mrb[17].mxu0  ;;  %v532_v37 = vpop.f32.mrb[17].mxu1  ;;  %3341 = vmatprep.subr.bf16.mxu0 %v5333_v2  ;;  %v779_v10 = vld [vmem:[%s5220_s1 + $0xc8] sm:$0xff] }
  0xfe   :  { %v4483_v57 = vmul.f32 %v775_v1, %v532_v37  ;;  %1053 = vmatprep.mubr.f32.mxu0 %v955_v18  ;;  %5346 = vst [vmem:[#allocation42_spill] sm:$0xff] %v4495_v61  ;;  %v4498_v37 = vmul.f32 %v779_v10, %v4363_v38 }
  0xff   :  { %5343 = vst [vmem:[#allocation39_spill] sm:$0xff] %v4466_v56  ;;  %v959_v11 = vmul.f32 %v4466_v56, %v4464_v7  ;;  %1054 = vmatmul.mubr.f32.gmra.mrb[54].mxu0 %v954_v3  ;;  %v933_v3 = vld [vmem:[%s5219_s4 + $0x250] sm:$0xff]  ;;  %v934_v56 = vld [vmem:[%s5219_s4 + $0x258] sm:$0xff] }
 0x100   :  { %5345 = vst [vmem:[#allocation41_spill] sm:$0xff] %v4483_v57  ;;  %v960_v17 = vmul.f32 %v4483_v57, %v4478_v4  ;;  %3343 = vmatpush3.bf16.msra.mxu0 %v4461_v30  ;;  %v4493_v12 = vpop.f32.mrb[18].mxu0  ;;  %v536_v8 = vpop.f32.mrb[18].mxu1  ;;  %5347 = vst [vmem:[#allocation43_spill] sm:$0xff] %v4498_v37  ;;  %v4527_v7 = vpack.c.bf16 %v934_v56, %v933_v3  ;;  %v4542_v56 = vmul.f32 %v785_v6, %v4402_v47 }
 0x101   :  { %v4500_v18 = vmul.f32 %v779_v10, %v536_v8  ;;  %v4502_v1 = vpop.f32.mrb[19].mxu0  ;;  %v538_v0 = vpop.f32.mrb[19].mxu1  ;;  %3344 = vmatprep.subr.bf16.mxu0 %v5333_v2  ;;  %v784_v8 = vld [vmem:[%s5220_s1 + $0xf0] sm:$0xff] }
 0x102   :  { %v4517_v38 = vmul.f32 %v780_v24, %v538_v0  ;;  %1058 = vmatprep.mubr.f32.mxu0 %v960_v17  ;;  %v4530_v0 = vmul.f32 %v784_v8, %v4394_v42  ;;  %v758_v42 = vld [vmem:[%s5220_s1 + $0x20] sm:$0xff] }
 0x103   :  { %5348 = vst [vmem:[#allocation44_spill] sm:$0xff] %v4500_v18  ;;  %v964_v10 = vmul.f32 %v4500_v18, %v4498_v37  ;;  %1059 = vmatmul.mubr.f32.gmra.mrb[56].mxu0 %v959_v11  ;;  %v935_v11 = vld [vmem:[%s5219_s4 + $0x260] sm:$0xff]  ;;  %v936_v18 = vld [vmem:[%s5219_s4 + $0x268] sm:$0xff] }
 0x104   :  { %5349 = vst [vmem:[#allocation45_spill] sm:$0xff] %v4517_v38  ;;  %v965_v57 = vmul.f32 %v4517_v38, %v4512_v25  ;;  %3346 = vmatpush3.bf16.msra.mxu0 %v4495_v61  ;;  %v378_v16 = vpop.f32.mrb[20].mxu0  ;;  %v542_v30 = vpop.f32.mrb[20].mxu1  ;;  %v4554_v47 = vpack.c.bf16 %v936_v18, %v935_v11  ;;  %v763_v18 = vld [vmem:[%s5220_s1 + $0x48] sm:$0xff] }
 0x105   :  { %v4532_v17 = vmul.f32 %v784_v8, %v542_v30  ;;  %v2927_v24 = vpop.f32.mrb[21].mxu0  ;;  %v544_v4 = vpop.f32.mrb[21].mxu1  ;;  %3347 = vmatprep.subr.bf16.mxu0 %v5333_v2  ;;  %v4556_v61 = vmul.f32 %v758_v42, %v378_v16 }
 0x106   :  { %v4547_v30 = vmul.f32 %v785_v6, %v544_v4  ;;  %1063 = vmatprep.mubr.f32.mxu0 %v965_v57  ;;  %v937_v6 = vld [vmem:[%s5219_s4 + $0x270] sm:$0xff] }
 0x107   :  { %5350 = vst [vmem:[#allocation46_spill] sm:$0xff] %v4532_v17  ;;  %v969_v3 = vmul.f32 %v4532_v17, %v4530_v0  ;;  %1064 = vmatmul.mubr.f32.gmra.mrb[58].mxu0 %v964_v10  ;;  %5352 = vst [vmem:[#allocation48_spill] sm:$0xff] %v4556_v61  ;;  %v938_v10 = vld [vmem:[%s5219_s4 + $0x278] sm:$0xff] }
 0x108   :  { %5351 = vst [vmem:[#allocation47_spill] sm:$0xff] %v4547_v30  ;;  %v970_v8 = vmul.f32 %v4547_v30, %v4542_v56  ;;  %3349 = vmatpush3.bf16.msra.mxu0 %v4527_v7  ;;  %v383_v24 = vpop.f32.mrb[22].mxu0  ;;  %v720_v38 = vpop.f32.mrb[22].mxu1 }
 0x109   :  { %v4558_v37 = vmul.f32 %v758_v42, %v720_v38  ;;  %v2930_v4 = vpop.f32.mrb[23].mxu0  ;;  %3350 = vmatprep.subr.bf16.mxu0 %v5333_v2  ;;  %v2952_v57 = vpop.f32.mrb[23].mxu1  ;;  %v4573_v42 = vpack.c.bf16 %v938_v10, %v937_v6 }
 0x10a   :  { %1068 = vmatprep.mubr.f32.mxu0 %v970_v8  ;;  %v5354_v4 = vmov 0.0   ;;  %v4577_v57 = vmul.f32 %v763_v18, %v383_v24 }
 0x10b   :  { %5353 = vst [vmem:[#allocation49_spill] sm:$0xff] %v4558_v37  ;;  %v943_v38 = vmul.f32 %v4558_v37, %v4556_v61  ;;  %1069 = vmatmul.mubr.f32.gmra.mrb[60].mxu0 %v969_v3  ;;  %v768_v3 = vld [vmem:[%s5220_s1 + $0x70] sm:$0xff] }
 0x10c   :  { %3352 = vmatpush3.bf16.msra.mxu0 %v4554_v47  ;;  %v388_v16 = vpop.f32.mrb[24].mxu0  ;;  %v725_v11 = vpop.f32.mrb[24].mxu1  ;;  %3003 = vmatprep.mubr.msk.f32.mxu0 %vm3627_vm4, %v5354_v4  ;;  %5355 = vst [vmem:[#allocation50_spill] sm:$0xff] %v4577_v57 }
 0x10d   :  { %v4579_v17 = vmul.f32 %v763_v18, %v725_v11  ;;  %v2933_v30 = vpop.f32.mrb[25].mxu0  ;;  %3353 = vmatprep.subr.bf16.mxu0 %v5333_v2  ;;  %v2955_v8 = vpop.f32.mrb[25].mxu1  ;;  %v4588_v61 = vmul.f32 %v768_v3, %v388_v16  ;;  %v773_v11 = vld [vmem:[%s5220_s1 + $0x98] sm:$0xff] }
 0x10f   :  { %5356 = vst [vmem:[#allocation51_spill] sm:$0xff] %v4579_v17  ;;  %v948_v37 = vmul.f32 %v4579_v17, %v4577_v57  ;;  %5357 = vst [vmem:[#allocation52_spill] sm:$0xff] %v4588_v61 }
 0x110   :  { %3355 = vmatpush3.bf16.msra.mxu0 %v4573_v42  ;;  %v393_v6 = vpop.f32.mrb[26].mxu0  ;;  %v730_v10 = vpop.f32.mrb[26].mxu1 }
 0x111   :  { %v4590_v24 = vmul.f32 %v768_v3, %v730_v10  ;;  %v2936_v18 = vpop.f32.mrb[27].mxu0  ;;  %3389 = vmatprep.subr.bf16.mxu0 %v4124_v20  ;;  %v2958_v30 = vpop.f32.mrb[27].mxu1  ;;  %v4601_v16 = vmul.f32 %v773_v11, %v393_v6 }
 0x112   :  { %v778_v30 = vld [vmem:[%s5220_s1 + $0xc0] sm:$0xff] }
 0x113   :  { %5358 = vst [vmem:[#allocation53_spill] sm:$0xff] %v4590_v24  ;;  %v953_v8 = vmul.f32 %v4590_v24, %v4588_v61  ;;  %3004 = vmatmul.mubr.f32.vlgmr.msra.gmra.mrb[62].mxu0 %v943_v38  ;;  %5359 = vst [vmem:[#allocation54_spill] sm:$0xff] %v4601_v16 }
 0x114   :  { %3391 = vmatpush3.bf16.msra.mxu0 %v4132_v23  ;;  %v398_v17 = vpop.f32.mrb[28].mxu0  ;;  %v735_v57 = vpop.f32.mrb[28].mxu1  ;;  %3006 = vmatprep.mubr.msk.f32.mxu0 %vm3627_vm4, %v5354_v4 }
 0x115   :  { %v4603_v3 = vmul.f32 %v773_v11, %v735_v57  ;;  %v2939_v10 = vpop.f32.mrb[29].mxu0  ;;  %3393 = vmatprep.subr.bf16.mxu0 %v4142_v26  ;;  %v2961_v18 = vpop.f32.mrb[29].mxu1  ;;  %v4614_v57 = vmul.f32 %v778_v30, %v398_v17 }
 0x116   :  { %v783_v18 = vld [vmem:[%s5220_s1 + $0xe8] sm:$0xff] }
 0x117   :  { %5360 = vst [vmem:[#allocation55_spill] sm:$0xff] %v4603_v3  ;;  %v958_v38 = vmul.f32 %v4603_v3, %v4601_v16  ;;  %3007 = vmatmul.mubr.f32.gmra.mrb[64].mxu0 %v948_v37  ;;  %5361 = vst [vmem:[#allocation56_spill] sm:$0xff] %v4614_v57 }
 0x118   :  { %3395 = vmatpush3.bf16.msra.mxu0 %v4150_v29  ;;  %v403_v24 = vpop.f32.mrb[30].mxu0  ;;  %v740_v61 = vpop.f32.mrb[30].mxu1  ;;  %3009 = vmatprep.mubr.msk.f32.mxu0 %vm3627_vm4, %v5354_v4 }
 0x119   :  { %v4616_v6 = vmul.f32 %v778_v30, %v740_v61  ;;  %v2942_v11 = vpop.f32.mrb[31].mxu0  ;;  %3397 = vmatprep.subr.bf16.mxu0 %v4160_v32  ;;  %v2964_v10 = vpop.f32.mrb[31].mxu1  ;;  %v4627_v61 = vmul.f32 %v783_v18, %v403_v24 }
 0x11a   :  { %v756_v10 = vld [vmem:[%s5220_s1 + $0x10] sm:$0xff] }
 0x11b   :  { %5362 = vst [vmem:[#allocation57_spill] sm:$0xff] %v4616_v6  ;;  %v963_v37 = vmul.f32 %v4616_v6, %v4614_v57  ;;  %3010 = vmatmul.mubr.f32.gmra.mrb[66].mxu0 %v953_v8  ;;  %5363 = vst [vmem:[#allocation58_spill] sm:$0xff] %v4627_v61  ;;  %v788_v8 = vld [vmem:[%s5220_s1 + $0x110] sm:$0xff]  ;;  %v757_v6 = vld [vmem:[%s5220_s1 + $0x18] sm:$0xff] }
 0x11c   :  { %3399 = vmatpush3.bf16.msra.mxu0 %v4168_v36  ;;  %v408_v3 = vpop.f32.mrb[32].mxu0  ;;  %v745_v16 = vpop.f32.mrb[32].mxu1  ;;  %3012 = vmatprep.mubr.msk.f32.mxu0 %vm3627_vm4, %v5354_v4 }
 0x11d   :  { %v4629_v17 = vmul.f32 %v783_v18, %v745_v16  ;;  %v2945_v30 = vpop.f32.mrb[33].mxu0  ;;  %3401 = vmatprep.subr.bf16.mxu0 %v4178_v41  ;;  %v2967_v11 = vpop.f32.mrb[33].mxu1 }
 0x11e   :  { %v4647_v30 = vmul.f32 %v756_v10, %v4426_v60  ;;  %v4649_v11 = vmul.f32 %v788_v8, %v408_v3  ;;  %v762_v60 = vld [vmem:[%s5220_s1 + $0x40] sm:$0xff] }
 0x11f   :  { %5364 = vst [vmem:[#allocation59_spill] sm:$0xff] %v4629_v17  ;;  %v968_v24 = vmul.f32 %v4629_v17, %v4627_v61  ;;  %3013 = vmatmul.mubr.f32.gmra.mrb[68].mxu0 %v958_v38  ;;  %v792_v17 = vmul.f32 %v757_v6, %v4434_v27  ;;  %v761_v61 = vld [vmem:[%s5220_s1 + $0x38] sm:$0xff] }
 0x120   :  { %3403 = vmatpush3.bf16.msra.mxu0 %v4186_v44  ;;  %v613_v16 = vpop.f32.mrb[34].mxu0  ;;  %v750_v18 = vpop.f32.mrb[34].mxu1  ;;  %3015 = vmatprep.mubr.msk.f32.mxu0 %vm3627_vm4, %v5354_v4 }
 0x121   :  { %v4651_v57 = vmul.f32 %v756_v10, %v613_v16  ;;  %v4653_v41 = vmul.f32 %v788_v8, %v750_v18  ;;  %v615_v36 = vpop.f32.mrb[35].mxu0  ;;  %3405 = vmatprep.subr.bf16.mxu0 %v4196_v50  ;;  %v2970_v38 = vpop.f32.mrb[35].mxu1  ;;  %v797_v18 = vmul.f32 %v762_v60, %v4468_v13 }
 0x122   :  { %v4660_v44 = vmul.f32 %v757_v6, %v615_v36  ;;  %v796_v36 = vmul.f32 %v761_v61, %v4459_v15 }
 0x123   :  { %5365 = vst [vmem:[#allocation60_spill] sm:$0xff] %v4653_v41  ;;  %v941_v3 = vmul.f32 %v4651_v57, %v4647_v30  ;;  %v973_v10 = vmul.f32 %v4653_v41, %v4649_v11  ;;  %3016 = vmatmul.mubr.f32.gmra.mrb[70].mxu0 %v963_v37  ;;  %v766_v37 = vld [vmem:[%s5220_s1 + $0x60] sm:$0xff]  ;;  %v767_v41 = vld [vmem:[%s5220_s1 + $0x68] sm:$0xff] }
 0x124   :  { %v942_v8 = vmul.f32 %v4660_v44, %v792_v17  ;;  %3407 = vmatpush3.bf16.msra.mxu0 %v4204_v54  ;;  %v619_v27 = vpop.f32.mrb[36].mxu0  ;;  %3018 = vmatprep.mubr.msk.f32.mxu0 %vm3627_vm4, %v5354_v4 }
 0x125   :  { %v4674_v6 = vmul.f32 %v761_v61, %v619_v27  ;;  %v621_v16 = vpop.f32.mrb[37].mxu0  ;;  %3409 = vmatprep.subr.bf16.mxu0 %v4214_v59  ;;  %v801_v27 = vmul.f32 %v766_v37, %v4493_v12 }
 0x126   :  { %v4681_v38 = vmul.f32 %v762_v60, %v621_v16  ;;  %1138 = vmatprep.mubr.f32.mxu1 %v942_v8  ;;  %v1277_v16 = vmul.f32 %v792_v17, %v792_v17 }
 0x127   :  { %5366 = vst [vmem:[#allocation61_spill] sm:$0xff] %v4674_v6  ;;  %v946_v15 = vmul.f32 %v4674_v6, %v796_v36  ;;  %3019 = vmatmul.mubr.f32.gmra.mrb[72].mxu0 %v968_v24  ;;  %1139 = vmatmul.mubr.f32.vlgmr.msra.gmra.mrb[36].mxu1 %v941_v3  ;;  %v802_v24 = vmul.f32 %v767_v41, %v4502_v1 }
 0x128   :  { %v947_v61 = vmul.f32 %v4681_v38, %v797_v18  ;;  %3359 = vmatpush3.bf16.msra.mxu1 %v3972_v39  ;;  %3411 = vmatpush3.bf16.msra.mxu0 %v4222_v63  ;;  %v625_v13 = vpop.f32.mrb[38].mxu0 }
 0x129   :  { %v4691_v60 = vmul.f32 %v766_v37, %v625_v13  ;;  %v627_v8 = vpop.f32.mrb[39].mxu0  ;;  %3021 = vmatprep.mubr.msk.f32.mxu0 %vm3627_vm4, %v5354_v4  ;;  %3361 = vmatprep.subr.bf16.mxu1 %v3974_v40 }
 0x12a   :  { %v4697_v3 = vmul.f32 %v767_v41, %v627_v8  ;;  %1143 = vmatprep.mubr.f32.mxu1 %v947_v61  ;;  %3413 = vmatprep.subr.bf16.mxu0 %v4232_v5  ;;  %v1276_v61 = vmul.f32 %v4647_v30, %v4647_v30 }
 0x12b   :  { %v951_v6 = vmul.f32 %v4691_v60, %v801_v27  ;;  %3022 = vmatmul.mubr.f32.gmra.mrb[74].mxu0 %v973_v10  ;;  %1144 = vmatmul.mubr.f32.gmra.mrb[38].mxu1 %v946_v15 }
 0x12c   :  { %v952_v12 = vmul.f32 %v4697_v3, %v802_v24  ;;  %3363 = vmatpush3.bf16.msra.mxu1 %v3994_v45  ;;  %3415 = vmatpush3.bf16.msra.mxu0 %v4240_v9  ;;  %v631_v37 = vpop.f32.mrb[40].mxu0 }
 0x12d   :  { %1473 = vmatprep.mubr.f32.mxu0 %v1277_v16  ;;  %v4705_v1 = vmul.f32 %v4266_v21, %v631_v37  ;;  %v633_v41 = vpop.f32.mrb[41].mxu0  ;;  %3365 = vmatprep.subr.bf16.mxu1 %v3997_v46 }
 0x12e   :  { %v4709_v17 = vmul.f32 %v4271_v22, %v633_v41  ;;  %1148 = vmatprep.mubr.f32.mxu1 %v952_v12  ;;  %3417 = vmatprep.subr.bf16.mxu0 %v4250_v14  ;;  %v1281_v12 = vmul.f32 %v796_v36, %v796_v36  ;;  %v5367_v36 = vld [vmem:[#allocation13_spill] sm:$0xff] }
 0x12f   :  { %v956_v10 = vmul.f32 %v4705_v1, %v4274_v28  ;;  %1149 = vmatmul.mubr.f32.gmra.mrb[40].mxu1 %v951_v6  ;;  %v1282_v6 = vmul.f32 %v797_v18, %v797_v18  ;;  %v1287_v18 = vmul.f32 %v802_v24, %v802_v24 }
 0x130   :  { %v957_v15 = vmul.f32 %v4709_v17, %v4277_v31  ;;  %3367 = vmatpush3.bf16.msra.mxu1 %v4009_v49  ;;  %3419 = vmatpush3.bf16.msra.mxu0 %v4258_v19  ;;  %v637_v21 = vpop.f32.mrb[42].mxu0 }
 0x131   :  { %v4721_v22 = vmul.f32 %v4282_v33, %v637_v21  ;;  %v639_v13 = vpop.f32.mrb[43].mxu0  ;;  %3369 = vmatprep.subr.bf16.mxu1 %v4025_v52  ;;  %3445 = vmatprep.subr.bf16.mxu0 %v3899_v34 }
 0x132   :  { %v4726_v8 = vmul.f32 %v4287_v35, %v639_v13  ;;  %1153 = vmatprep.mubr.f32.mxu1 %v957_v15  ;;  %v1286_v15 = vmul.f32 %v801_v27, %v801_v27  ;;  %v5371_v13 = vld [vmem:[#allocation15_spill] sm:$0xff] }
 0x133   :  { %v961_v16 = vmul.f32 %v4721_v22, %v4290_v43  ;;  %1474 = vmatmul.mubr.f32.vlgmr.msra.gmra.mrb[76].mxu0 %v1276_v61  ;;  %1154 = vmatmul.mubr.f32.gmra.mrb[42].mxu1 %v956_v10  ;;  %v1292_v61 = vmul.f32 %v4277_v31, %v4277_v31  ;;  %v1291_v31 = vmul.f32 %v4274_v28, %v4274_v28 }
 0x134   :  { %v962_v30 = vmul.f32 %v4726_v8, %v4293_v48  ;;  %3371 = vmatpush3.bf16.msra.mxu1 %v4035_v55  ;;  %1478 = vmatprep.mubr.f32.mxu0 %v1282_v6  ;;  %v643_v33 = vpop.f32.mrb[44].mxu0  ;;  %v1296_v28 = vmul.f32 %v4290_v43, %v4290_v43  ;;  %v1301_v43 = vmul.f32 %v4306_v62, %v4306_v62 }
 0x135   :  { %3447 = vmatpush3.bf16.msra.mxu0 %v3972_v39  ;;  %v4735_v34 = vmul.f32 %v4298_v51, %v643_v33  ;;  %v645_v35 = vpop.f32.mrb[45].mxu0  ;;  %3373 = vmatprep.subr.bf16.mxu1 %v4046_v58  ;;  %v5368_v51 = vld [vmem:[#allocation3_spill] sm:$0xff]  ;;  %v5374_v33 = vld [vmem:[#allocation5_spill] sm:$0xff] }
 0x136   :  { %v4739_v37 = vmul.f32 %v4303_v53, %v645_v35  ;;  %1158 = vmatprep.mubr.f32.mxu1 %v962_v30  ;;  %3449 = vmatprep.subr.bf16.mxu0 %v3974_v40  ;;  %v5369_v53 = vld [vmem:[#allocation14_spill] sm:$0xff]  ;;  %v5370_v40 = vld [vmem:[#allocation4_spill] sm:$0xff] }
 0x137   :  { %v966_v41 = vmul.f32 %v4735_v34, %v4306_v62  ;;  %1479 = vmatmul.mubr.f32.gmra.mrb[78].mxu0 %v1281_v12  ;;  %1159 = vmatmul.mubr.f32.gmra.mrb[44].mxu1 %v961_v16  ;;  %v5372_v16 = vld [vmem:[#allocation16_spill] sm:$0xff]  ;;  %v5375_v12 = vld [vmem:[#allocation6_spill] sm:$0xff] }
 0x138   :  { %v967_v39 = vmul.f32 %v4739_v37, %v5367_v36  ;;  %3375 = vmatpush3.bf16.msra.mxu1 %v5368_v51  ;;  %1483 = vmatprep.mubr.f32.mxu0 %v1287_v18  ;;  %v649_v10 = vpop.f32.mrb[46].mxu0  ;;  %v5376_v35 = vld [vmem:[#allocation20_spill] sm:$0xff]  ;;  %v1306_v62 = vmul.f32 %v5372_v16, %v5372_v16 }
 0x139   :  { %3451 = vmatpush3.bf16.msra.mxu0 %v3994_v45  ;;  %v4749_v24 = vmul.f32 %v5369_v53, %v649_v10  ;;  %v651_v21 = vpop.f32.mrb[47].mxu0  ;;  %3377 = vmatprep.subr.bf16.mxu1 %v5370_v40  ;;  %v5373_v45 = vld [vmem:[#allocation17_spill] sm:$0xff]  ;;  %v1275_v18 = vmul.f32 %v5376_v35, %v5376_v35  ;;  %v5391_v35 = vld [vmem:[#allocation19_spill] sm:$0xff] }
 0x13a   :  { %v4755_v6 = vmul.f32 %v5371_v13, %v651_v21  ;;  %1163 = vmatprep.mubr.f32.mxu1 %v967_v39  ;;  %3453 = vmatprep.subr.bf16.mxu0 %v3997_v46  ;;  %v1297_v46 = vmul.f32 %v4293_v48, %v4293_v48  ;;  %v5378_v48 = vld [vmem:[#allocation8_spill] sm:$0xff]  ;;  %v5380_v39 = vld [vmem:[#allocation18_spill] sm:$0xff]  ;;  %v5385_v13 = vld [vmem:[#allocation21_spill] sm:$0xff] }
 0x13b   :  { %v971_v27 = vmul.f32 %v4749_v24, %v5372_v16  ;;  %1484 = vmatmul.mubr.f32.gmra.mrb[80].mxu0 %v1286_v15  ;;  %1164 = vmatmul.mubr.f32.gmra.mrb[46].mxu1 %v966_v41  ;;  %v5377_v41 = vld [vmem:[#allocation7_spill] sm:$0xff]  ;;  %v1274_v10 = vmul.f32 %v5380_v39, %v5380_v39  ;;  %v5384_v21 = vld [vmem:[#allocation30_spill] sm:$0xff] }
 0x13c   :  { %v972_v30 = vmul.f32 %v4755_v6, %v5373_v45  ;;  %3379 = vmatpush3.bf16.msra.mxu1 %v5374_v33  ;;  %1488 = vmatprep.mubr.f32.mxu0 %v1292_v61  ;;  %v5382_v15 = vld [vmem:[#allocation23_spill] sm:$0xff]  ;;  %v1285_v61 = vmul.f32 %v5384_v21, %v5384_v21  ;;  %v5394_v39 = vld [vmem:[#allocation38_spill] sm:$0xff] }
 0x13d   :  { %3455 = vmatpush3.bf16.msra.mxu0 %v4009_v49  ;;  %3381 = vmatprep.subr.bf16.mxu1 %v5375_v12  ;;  %v1302_v49 = vmul.f32 %v5367_v36, %v5367_v36  ;;  %v1279_v53 = vmul.f32 %v5382_v15, %v5382_v15  ;;  %v5399_v21 = vld [vmem:[#allocation42_spill] sm:$0xff] }
 0x13e   :  { %1168 = vmatprep.mubr.f32.mxu1 %v972_v30  ;;  %3457 = vmatprep.subr.bf16.mxu0 %v4025_v52  ;;  %v5379_v52 = vld [vmem:[#allocation9_spill] sm:$0xff]  ;;  %v5388_v30 = vld [vmem:[#allocation35_spill] sm:$0xff] }
 0x13f   :  { %1489 = vmatmul.mubr.f32.gmra.mrb[82].mxu0 %v1291_v31  ;;  %1169 = vmatmul.mubr.f32.gmra.mrb[48].mxu1 %v971_v27  ;;  %v5386_v27 = vld [vmem:[#allocation28_spill] sm:$0xff]  ;;  %v5389_v31 = vld [vmem:[#allocation33_spill] sm:$0xff] }
 0x140   :  { %3383 = vmatpush3.bf16.msra.mxu1 %v5377_v41  ;;  %1493 = vmatprep.mubr.f32.mxu0 %v1297_v46  ;;  %v1284_v16 = vmul.f32 %v5386_v27, %v5386_v27  ;;  %v5390_v46 = vld [vmem:[#allocation32_spill] sm:$0xff]  ;;  %v1304_v27 = vmul.f32 %v4530_v0, %v4530_v0  ;;  %v5404_v0 = vld [vmem:[#allocation39_spill] sm:$0xff] }
 0x141   :  { %3459 = vmatpush3.bf16.msra.mxu0 %v4035_v55  ;;  %1373 = vmatprep.mubr.f32.mxu1 %v1275_v18  ;;  %v5381_v55 = vld [vmem:[#allocation25_spill] sm:$0xff]  ;;  %v1609_v18 = vmul.f32 %v5391_v35, %v5391_v35 }
 0x142   :  { %3385 = vmatprep.subr.bf16.mxu1 %v5378_v48  ;;  %3461 = vmatprep.subr.bf16.mxu0 %v4046_v58  ;;  %v1280_v36 = vmul.f32 %v5381_v55, %v5381_v55  ;;  %v1307_v58 = vmul.f32 %v5373_v45, %v5373_v45  ;;  %v5387_v45 = vld [vmem:[#allocation27_spill] sm:$0xff] }
 0x143   :  { %1494 = vmatmul.mubr.f32.gmra.mrb[84].mxu0 %v1296_v28 }
 0x144   :  { %3387 = vmatpush3.bf16.msra.mxu1 %v5379_v52  ;;  %1498 = vmatprep.mubr.f32.mxu0 %v1302_v49  ;;  %v5393_v49 = vld [vmem:[#allocation26_spill] sm:$0xff] }
 0x145   :  { %3463 = vmatpush3.bf16.msra.mxu0 %v5368_v51  ;;  %3420 = vmatprep.subr.bf16.mxu1 %v5333_v2  ;;  %v5383_v51 = vld [vmem:[#allocation22_spill] sm:$0xff] }
 0x146   :  { %3465 = vmatprep.subr.bf16.mxu0 %v5370_v40  ;;  %v1610_v40 = vmul.f32 %v5385_v13, %v5385_v13  ;;  %v5401_v13 = vld [vmem:[#allocation36_spill] sm:$0xff] }
 0x147   :  { %1374 = vmatmul.mubr.f32.vlgmr.msra.gmra.mrb[50].mxu1 %v1274_v10  ;;  %1499 = vmatmul.mubr.f32.gmra.mrb[86].mxu0 %v1301_v43  ;;  %v1294_v10 = vmul.f32 %v5394_v39, %v5394_v39  ;;  %v5396_v43 = vld [vmem:[#allocation24_spill] sm:$0xff] }
 0x148   :  { %1378 = vmatprep.mubr.f32.mxu1 %v1280_v36  ;;  %1503 = vmatprep.mubr.f32.mxu0 %v1307_v58  ;;  %v1614_v55 = vmul.f32 %v5396_v43, %v5396_v43  ;;  %v1300_v36 = vmul.f32 %v4512_v25, %v4512_v25  ;;  %v5397_v58 = vld [vmem:[#allocation31_spill] sm:$0xff] }
 0x149   :  { %3422 = vmatpush3.bf16.msra.mxu1 %v5383_v51  ;;  %3467 = vmatpush3.bf16.msra.mxu0 %v5374_v33  ;;  %v1290_v33 = vmul.f32 %v5388_v30, %v5388_v30  ;;  %v1620_v15 = vmul.f32 %v5397_v58, %v5397_v58  ;;  %v5414_v43 = vld [vmem:[#allocation11_spill] sm:$0xff] }
 0x14a   :  { %3423 = vmatprep.subr.bf16.mxu1 %v5333_v2  ;;  %3469 = vmatprep.subr.bf16.mxu0 %v5375_v12  ;;  %v1289_v12 = vmul.f32 %v5389_v31, %v5389_v31  ;;  %v5405_v31 = vld [vmem:[#allocation45_spill] sm:$0xff] }
 0x14b   :  { %1379 = vmatmul.mubr.f32.gmra.mrb[52].mxu1 %v1279_v53  ;;  %1504 = vmatmul.mubr.f32.gmra.mrb[88].mxu0 %v1306_v62  ;;  %v5398_v53 = vld [vmem:[#allocation43_spill] sm:$0xff] }
 0x14c   :  { %1383 = vmatprep.mubr.f32.mxu1 %v1285_v61  ;;  %1708 = vmatprep.mubr.f32.mxu0 %v1610_v40  ;;  %v1299_v62 = vmul.f32 %v5398_v53, %v5398_v53  ;;  %v5400_v61 = vld [vmem:[#allocation29_spill] sm:$0xff]  ;;  %v1625_v40 = vmul.f32 %v5401_v13, %v5401_v13  ;;  %v5419_v53 = vld [vmem:[#allocation58_spill] sm:$0xff] }
 0x14d   :  { %3425 = vmatpush3.bf16.msra.mxu1 %v5387_v45  ;;  %3471 = vmatpush3.bf16.msra.mxu0 %v5377_v41  ;;  %v5392_v41 = vld [vmem:[#allocation40_spill] sm:$0xff]  ;;  %v1619_v25 = vmul.f32 %v5400_v61, %v5400_v61 }
 0x14e   :  { %3426 = vmatprep.subr.bf16.mxu1 %v5333_v2  ;;  %3473 = vmatprep.subr.bf16.mxu0 %v5378_v48  ;;  %v1295_v28 = vmul.f32 %v5392_v41, %v5392_v41  ;;  %v1615_v48 = vmul.f32 %v5393_v49, %v5393_v49 }
 0x14f   :  { %1384 = vmatmul.mubr.f32.gmra.mrb[54].mxu1 %v1284_v16  ;;  %v5402_v16 = vld [vmem:[#allocation34_spill] sm:$0xff] }
 0x150   :  { %1388 = vmatprep.mubr.f32.mxu1 %v1290_v33  ;;  %v1629_v33 = vmul.f32 %v5404_v0, %v5404_v0 }
 0x151   :  { %3428 = vmatpush3.bf16.msra.mxu1 %v5390_v46  ;;  %3475 = vmatpush3.bf16.msra.mxu0 %v5379_v52  ;;  %v5395_v52 = vld [vmem:[#allocation37_spill] sm:$0xff] }
 0x152   :  { %3429 = vmatprep.subr.bf16.mxu1 %v5333_v2  ;;  %3508 = vmatprep.subr.bf16.mxu0 %v5333_v2 }
 0x153   :  { %1389 = vmatmul.mubr.f32.gmra.mrb[56].mxu1 %v1289_v12  ;;  %v1635_v12 = vmul.f32 %v5405_v31, %v5405_v31 }
 0x154   :  { %1709 = vmatmul.mubr.f32.vlgmr.msra.gmra.mrb[90].mxu0 %v1609_v18  ;;  %1393 = vmatprep.mubr.f32.mxu1 %v1295_v28  ;;  %v5407_v18 = vld [vmem:[#allocation48_spill] sm:$0xff]  ;;  %v5408_v28 = vld [vmem:[#allocation47_spill] sm:$0xff] }
 0x155   :  { %3431 = vmatpush3.bf16.msra.mxu1 %v5395_v52  ;;  %1713 = vmatprep.mubr.f32.mxu0 %v1615_v48  ;;  %v1278_v41 = vmul.f32 %v5407_v18, %v5407_v18  ;;  %v1640_v49 = vmul.f32 %v5408_v28, %v5408_v28  ;;  %v5409_v48 = vld [vmem:[#allocation46_spill] sm:$0xff] }
 0x156   :  { %3510 = vmatpush3.bf16.msra.mxu0 %v5383_v51  ;;  %3432 = vmatprep.subr.bf16.mxu1 %v5333_v2  ;;  %v1305_v51 = vmul.f32 %v4542_v56, %v4542_v56  ;;  %v1624_v56 = vmul.f32 %v5402_v16, %v5402_v16  ;;  %v1639_v39 = vmul.f32 %v5409_v48, %v5409_v48 }
 0x157   :  { %1394 = vmatmul.mubr.f32.gmra.mrb[58].mxu1 %v1294_v10  ;;  %3511 = vmatprep.subr.bf16.mxu0 %v5333_v2  ;;  %v5410_v10 = vld [vmem:[#allocation50_spill] sm:$0xff]  ;;  %v1626_v16 = vmul.f32 %v4705_v1, %v4705_v1  ;;  %v1641_v1 = vmul.f32 %v4749_v24, %v4749_v24 }
 0x158   :  { %1714 = vmatmul.mubr.f32.gmra.mrb[92].mxu0 %v1614_v55  ;;  %1398 = vmatprep.mubr.f32.mxu1 %v1300_v36  ;;  %v5416_v55 = vld [vmem:[#allocation12_spill] sm:$0xff] }
 0x159   :  { %3434 = vmatpush3.bf16.msra.mxu1 %v5399_v21  ;;  %1718 = vmatprep.mubr.f32.mxu0 %v1620_v15  ;;  %v5417_v36 = vld [vmem:[#allocation56_spill] sm:$0xff] }
 0x15a   :  { %3513 = vmatpush3.bf16.msra.mxu0 %v5387_v45  ;;  %3435 = vmatprep.subr.bf16.mxu1 %v5333_v2  ;;  %v5403_v45 = vld [vmem:[#allocation41_spill] sm:$0xff]  ;;  %v1298_v58 = vmul.f32 %v5417_v36, %v5417_v36 }
 0x15b   :  { %1399 = vmatmul.mubr.f32.gmra.mrb[60].mxu1 %v1299_v62  ;;  %3514 = vmatprep.subr.bf16.mxu0 %v5333_v2  ;;  %v1630_v30 = vmul.f32 %v5403_v45, %v5403_v45  ;;  %v1303_v62 = vmul.f32 %v5419_v53, %v5419_v53  ;;  %v1642_v45 = vmul.f32 %v4755_v6, %v4755_v6 }
 0x15c   :  { %1719 = vmatmul.mubr.f32.gmra.mrb[94].mxu0 %v1619_v25  ;;  %1403 = vmatprep.mubr.f32.mxu1 %v1305_v51  ;;  %v1617_v51 = vmul.f32 %v4681_v38, %v4681_v38  ;;  %v1621_v38 = vmul.f32 %v4691_v60, %v4691_v60  ;;  %v1637_v60 = vmul.f32 %v4739_v37, %v4739_v37 }
 0x15d   :  { %3437 = vmatpush3.bf16.msra.mxu1 %v4527_v7  ;;  %1723 = vmatprep.mubr.f32.mxu0 %v1625_v40  ;;  %v1622_v40 = vmul.f32 %v4697_v3, %v4697_v3  ;;  %v1632_v3 = vmul.f32 %v4726_v8, %v4726_v8 }
 0x15e   :  { %3516 = vmatpush3.bf16.msra.mxu0 %v5390_v46  ;;  %3438 = vmatprep.subr.bf16.mxu1 %v5333_v2  ;;  %v5406_v46 = vld [vmem:[#allocation44_spill] sm:$0xff] }
 0x15f   :  { %1404 = vmatmul.mubr.f32.gmra.mrb[62].mxu1 %v1304_v27  ;;  %3517 = vmatprep.subr.bf16.mxu0 %v5333_v2  ;;  %v1634_v35 = vmul.f32 %v5406_v46, %v5406_v46  ;;  %v1627_v27 = vmul.f32 %v4709_v17, %v4709_v17  ;;  %v1636_v17 = vmul.f32 %v4735_v34, %v4735_v34 }
 0x160   :  { %1724 = vmatmul.mubr.f32.gmra.mrb[96].mxu0 %v1624_v56  ;;  %3056 = vmatprep.mubr.msk.f32.mxu1 %vm3627_vm4, %v5354_v4  ;;  %v1631_v56 = vmul.f32 %v4721_v22, %v4721_v22 }
 0x161   :  { %3440 = vmatpush3.bf16.msra.mxu1 %v4554_v47  ;;  %1728 = vmatprep.mubr.f32.mxu0 %v1630_v30 }
 0x162   :  { %3519 = vmatpush3.bf16.msra.mxu0 %v5395_v52  ;;  %3441 = vmatprep.subr.bf16.mxu1 %v5333_v2  ;;  %v1283_v52 = vmul.f32 %v5410_v10, %v5410_v10 }
 0x163   :  { %3520 = vmatprep.subr.bf16.mxu0 %v5333_v2 }
 0x164   :  { %1729 = vmatmul.mubr.f32.gmra.mrb[98].mxu0 %v1629_v33 }
 0x165   :  { %3443 = vmatpush3.bf16.msra.mxu1 %v4573_v42  ;;  %1733 = vmatprep.mubr.f32.mxu0 %v1635_v12 }
 0x166   :  { %3522 = vmatpush3.bf16.msra.mxu0 %v5399_v21  ;;  %3477 = vmatprep.subr.bf16.mxu1 %v4124_v20  ;;  %v5411_v20 = vld [vmem:[#allocation52_spill] sm:$0xff]  ;;  %v5420_v21 = vld [vmem:[#allocation53_spill] sm:$0xff] }
 0x167   :  { %3523 = vmatprep.subr.bf16.mxu0 %v5333_v2  ;;  %v1623_v61 = vmul.f32 %v5420_v21, %v5420_v21 }
 0x168   :  { %3057 = vmatmul.mubr.f32.vlgmr.msra.gmra.mrb[64].mxu1 %v1278_v41  ;;  %1734 = vmatmul.mubr.f32.gmra.mrb[100].mxu0 %v1634_v35 }
 0x169   :  { %1738 = vmatprep.mubr.f32.mxu0 %v1640_v49  ;;  %3479 = vmatpush3.bf16.msra.mxu1 %v4132_v23  ;;  %v1288_v23 = vmul.f32 %v5411_v20, %v5411_v20 }
 0x16a   :  { %3525 = vmatpush3.bf16.msra.mxu0 %v4527_v7  ;;  %3059 = vmatprep.mubr.msk.f32.mxu1 %vm3627_vm4, %v5354_v4 }
 0x16b   :  { %3481 = vmatprep.subr.bf16.mxu1 %v4142_v26  ;;  %3526 = vmatprep.subr.bf16.mxu0 %v5333_v2  ;;  %v5412_v26 = vld [vmem:[#allocation10_spill] sm:$0xff] }
 0x16c   :  { %3060 = vmatmul.mubr.f32.gmra.mrb[66].mxu1 %v1283_v52  ;;  %1739 = vmatmul.mubr.f32.gmra.mrb[102].mxu0 %v1639_v39 }
 0x16d   :  { %3483 = vmatpush3.bf16.msra.mxu1 %v4150_v29  ;;  %3062 = vmatprep.mubr.msk.f32.mxu1 %vm3627_vm4, %v5354_v4  ;;  %v5413_v29 = vld [vmem:[#allocation54_spill] sm:$0xff] }
 0x16e   :  { %3528 = vmatpush3.bf16.msra.mxu0 %v4554_v47  ;;  %3485 = vmatprep.subr.bf16.mxu1 %v4160_v32  ;;  %v1293_v7 = vmul.f32 %v5413_v29, %v5413_v29  ;;  %v5415_v47 = vld [vmem:[#allocation49_spill] sm:$0xff] }
 0x16f   :  { %3529 = vmatprep.subr.bf16.mxu0 %v5333_v2  ;;  %3109 = vmatprep.mubr.msk.f32.mxu0 %vm3627_vm4, %v5354_v4  ;;  %v1613_v32 = vmul.f32 %v5415_v47, %v5415_v47  ;;  %v1986_v47 = vld [vmem:[%s5221_s5] sm:$0xf] }
 0x170   :  { %3063 = vmatmul.mubr.f32.gmra.mrb[68].mxu1 %v1288_v23 }
 0x171   :  { %3487 = vmatpush3.bf16.msra.mxu1 %v5412_v26  ;;  %3065 = vmatprep.mubr.msk.f32.mxu1 %vm3627_vm4, %v5354_v4 }
 0x172   :  { %3531 = vmatpush3.bf16.msra.mxu0 %v4573_v42  ;;  %3489 = vmatprep.subr.bf16.mxu1 %v5414_v43  ;;  %v5418_v42 = vld [vmem:[#allocation51_spill] sm:$0xff] }
 0x173   :  { %3541 = vmatprep.subr.bf16.mxu0 %v5333_v2  ;;  %v1618_v15 = vmul.f32 %v5418_v42, %v5418_v42 }
 0x174   :  { %3066 = vmatmul.mubr.f32.gmra.mrb[70].mxu1 %v1293_v7 }
 0x175   :  { %3110 = vmatmul.mubr.f32.vlgmr.msra.gmra.mrb[104].mxu0 %v1613_v32  ;;  %3491 = vmatpush3.bf16.msra.mxu1 %v5416_v55 }
 0x176   :  { %3068 = vmatprep.mubr.msk.f32.mxu1 %vm3627_vm4, %v5354_v4  ;;  %3112 = vmatprep.mubr.msk.f32.mxu0 %vm3627_vm4, %v5354_v4 }
 0x177   :  { %3493 = vmatprep.subr.bf16.mxu1 %v4196_v50  ;;  %v1308_v50 = vmul.f32 %v4649_v11, %v4649_v11 }
 0x178   :  { %3069 = vmatmul.mubr.f32.gmra.mrb[72].mxu1 %v1298_v58 }
 0x179   :  { %3113 = vmatmul.mubr.f32.gmra.mrb[106].mxu0 %v1618_v15  ;;  %3495 = vmatpush3.bf16.msra.mxu1 %v4204_v54  ;;  %v5421_v54 = vld [vmem:[#allocation55_spill] sm:$0xff] }
 0x17a   :  { %3071 = vmatprep.mubr.msk.f32.mxu1 %vm3627_vm4, %v5354_v4  ;;  %3115 = vmatprep.mubr.msk.f32.mxu0 %vm3627_vm4, %v5354_v4  ;;  %v1628_v25 = vmul.f32 %v5421_v54, %v5421_v54 }
 0x17b   :  { %3497 = vmatprep.subr.bf16.mxu1 %v4214_v59  ;;  %v1612_v59 = vmul.f32 %v4660_v44, %v4660_v44  ;;  %v5423_v44 = vld [vmem:[#allocation59_spill] sm:$0xff] }
 0x17c   :  { %3072 = vmatmul.mubr.f32.gmra.mrb[74].mxu1 %v1303_v62 }
 0x17d   :  { %3116 = vmatmul.mubr.f32.gmra.mrb[108].mxu0 %v1623_v61  ;;  %3499 = vmatpush3.bf16.msra.mxu1 %v4222_v63  ;;  %v5422_v63 = vld [vmem:[#allocation57_spill] sm:$0xff] }
 0x17e   :  { %3074 = vmatprep.mubr.msk.f32.mxu1 %vm3627_vm4, %v5354_v4  ;;  %3118 = vmatprep.mubr.msk.f32.mxu0 %vm3627_vm4, %v5354_v4  ;;  %v1633_v11 = vmul.f32 %v5422_v63, %v5422_v63 }
 0x17f   :  { %3501 = vmatprep.subr.bf16.mxu1 %v4232_v5  ;;  %v1611_v5 = vmul.f32 %v4651_v57, %v4651_v57  ;;  %v5425_v57 = vld [vmem:[#allocation60_spill] sm:$0xff] }
 0x180   :  { %3075 = vmatmul.mubr.f32.gmra.mrb[76].mxu1 %v1308_v50  ;;  %v1643_v13 = vmul.f32 %v5425_v57, %v5425_v57 }
 0x181   :  { %3119 = vmatmul.mubr.f32.gmra.mrb[110].mxu0 %v1628_v25  ;;  %3503 = vmatpush3.bf16.msra.mxu1 %v4240_v9  ;;  %v1638_v9 = vmul.f32 %v5423_v44, %v5423_v44 }
 0x182   :  { %1808 = vmatprep.mubr.f32.mxu1 %v1612_v59  ;;  %3121 = vmatprep.mubr.msk.f32.mxu0 %vm3627_vm4, %v5354_v4 }
 0x183   :  { %3505 = vmatprep.subr.bf16.mxu1 %v4250_v14  ;;  %v5424_v14 = vld [vmem:[#allocation61_spill] sm:$0xff] }
 0x185   :  { %3122 = vmatmul.mubr.f32.gmra.mrb[112].mxu0 %v1633_v11  ;;  %3507 = vmatpush3.bf16.msra.mxu1 %v4258_v19  ;;  %v1616_v19 = vmul.f32 %v5424_v14, %v5424_v14 }
 0x186   :  { %3124 = vmatprep.mubr.msk.f32.mxu0 %vm3627_vm4, %v5354_v4  ;;  %3130 = vmatprep.subr.mxu1 %v5354_v4 }
 0x188   :  { %1809 = vmatmul.mubr.f32.vlgmr.msra.gmra.mrb[78].mxu1 %v1611_v5 }
 0x189   :  { %3125 = vmatmul.mubr.f32.gmra.mrb[114].mxu0 %v1638_v9  ;;  %1813 = vmatprep.mubr.f32.mxu1 %v1617_v51 }
 0x18a   :  { %3127 = vmatprep.mubr.msk.f32.mxu0 %vm3627_vm4, %v5354_v4  ;;  %3131 = vmatpush3.msk.msra.mxu1 %vm2009_vm5, %v1986_v47 }
 0x18b   :  { %3532 = vmatprep.subr.bf16.mxu1 %v5333_v2 }
 0x18c   :  { %1814 = vmatmul.mubr.f32.gmra.mrb[80].mxu1 %v1616_v19 }
 0x18d   :  { %3128 = vmatmul.mubr.f32.gmra.mrb[116].mxu0 %v1643_v13  ;;  %1818 = vmatprep.mubr.f32.mxu1 %v1622_v40 }
 0x18e   :  { %3198 = vmatprep.mubr.msk.f32.mxu0 %vm3627_vm4, %v5354_v4 }
 0x190   :  { %1819 = vmatmul.mubr.f32.gmra.mrb[82].mxu1 %v1621_v38 }
 0x191   :  { %1823 = vmatprep.mubr.f32.mxu1 %v1627_v27 }
 0x194   :  { %1824 = vmatmul.mubr.f32.gmra.mrb[84].mxu1 %v1626_v16 }
 0x195   :  { %1828 = vmatprep.mubr.f32.mxu1 %v1632_v3 }
 0x198   :  { %1829 = vmatmul.mubr.f32.gmra.mrb[86].mxu1 %v1631_v56 }
 0x199   :  { %1833 = vmatprep.mubr.f32.mxu1 %v1637_v60 }
 0x19c   :  { %1834 = vmatmul.mubr.f32.gmra.mrb[88].mxu1 %v1636_v17 }
 0x19d   :  { %1838 = vmatprep.mubr.f32.mxu1 %v1642_v45 }
 0x1a0   :  { %1839 = vmatmul.mubr.f32.gmra.mrb[90].mxu1 %v1641_v1 }
 0x1a1   :  { %3132 = vmatprep.mubr.msk.f32.mxu1 %vm3627_vm4, %v5354_v4 }
 0x1c6   :  { %v2518_v22 = vpop.f32.mrb[48].mxu0 }
 0x1c7   :  { %v2519_v8 = vpop.f32.mrb[49].mxu0 }
 0x1c8   :  { %v2520_v37 = vadd.f32 %v2519_v8, %v2518_v22 }
 0x1ca   :  { %v2521_v30 = vpop.f32.mrb[50].mxu0 }
 0x1cb   :  { %v2522_v0 = vpop.f32.mrb[51].mxu0 }
 0x1cc   :  { %v2523_v33 = vadd.f32 %v2522_v0, %v2521_v30 }
 0x1ce   :  { %v2524_v31 = vpop.f32.mrb[52].mxu0 }
 0x1cf   :  { %v2525_v34 = vpop.f32.mrb[53].mxu0 }
 0x1d0   :  { %v2526_v12 = vadd.f32 %v2525_v34, %v2524_v31 }
 0x1d2   :  { %v2527_v46 = vpop.f32.mrb[54].mxu0 }
 0x1d3   :  { %v2528_v6 = vpop.f32.mrb[55].mxu0 }
 0x1d4   :  { %v2529_v35 = vadd.f32 %v2528_v6, %v2527_v46 }
 0x1d6   :  { %v2530_v18 = vpop.f32.mrb[56].mxu0 }
 0x1d7   :  { %v2531_v41 = vpop.f32.mrb[57].mxu0 }
 0x1d8   :  { %v2532_v28 = vadd.f32 %v2531_v41, %v2530_v18 }
 0x1da   :  { %v2533_v24 = vpop.f32.mrb[58].mxu0 }
 0x1db   :  { %v2534_v49 = vpop.f32.mrb[59].mxu0 }
 0x1dc   :  { %v2535_v48 = vadd.f32 %v2534_v49, %v2533_v24 }
 0x1de   :  { %v2536_v39 = vpop.f32.mrb[60].mxu0 }
 0x1df   :  { %v2537_v10 = vpop.f32.mrb[61].mxu0 }
 0x1e0   :  { %v4986_v52 = vadd.f32 %v2537_v10, %v2536_v39 }
 0x1e6   :  { %v1240_v20 = vpop.f32.mrb[62].mxu0 }
 0x1e7   :  { %v3005_v23 = vpop.f32.mrb[63].mxu0 }
 0x1ea   :  { %v1245_v26 = vpop.f32.mrb[64].mxu0 }
 0x1eb   :  { %v3008_v29 = vpop.f32.mrb[65].mxu0 }
 0x1ee   :  { %v1250_v7 = vpop.f32.mrb[66].mxu0 }
 0x1ef   :  { %v3011_v43 = vpop.f32.mrb[67].mxu0 }
 0x1f2   :  { %v1255_v32 = vpop.f32.mrb[68].mxu0 }
 0x1f3   :  { %v3014_v55 = vpop.f32.mrb[69].mxu0 }
 0x1f6   :  { %v1260_v36 = vpop.f32.mrb[70].mxu0 }
 0x1f7   :  { %v3017_v58 = vpop.f32.mrb[71].mxu0 }
 0x1fa   :  { %v1265_v42 = vpop.f32.mrb[72].mxu0  ;;  %v2571_v15 = vpop.f32.mrb[36].mxu1 }
 0x1fb   :  { %v3020_v53 = vpop.f32.mrb[73].mxu0  ;;  %v2572_v62 = vpop.f32.mrb[37].mxu1 }
 0x1fc   :  { %v2573_v21 = vadd.f32 %v2572_v62, %v2571_v15 }
 0x1fe   :  { %v1141_v61 = vadd.f32 %v2573_v21, %v2520_v37  ;;  %v1270_v50 = vpop.f32.mrb[74].mxu0  ;;  %v2574_v54 = vpop.f32.mrb[38].mxu1 }
 0x1ff   :  { %v3023_v25 = vpop.f32.mrb[75].mxu0  ;;  %v2575_v59 = vpop.f32.mrb[39].mxu1 }
 0x200   :  { %v4992_v63 = vadd.f32 %v1240_v20, %v1141_v61  ;;  %v2576_v11 = vadd.f32 %v2575_v59, %v2574_v54 }
 0x202   :  { %v1146_v5 = vadd.f32 %v2576_v11, %v2523_v33  ;;  %v2577_v44 = vpop.f32.mrb[40].mxu1 }
 0x203   :  { %v2578_v9 = vpop.f32.mrb[41].mxu1 }
 0x204   :  { %v4994_v51 = vadd.f32 %v1245_v26, %v1146_v5  ;;  %v2579_v14 = vadd.f32 %v2578_v9, %v2577_v44 }
 0x206   :  { %v1151_v19 = vadd.f32 %v2579_v14, %v2526_v12  ;;  %v2700_v57 = vpop.f32.mrb[76].mxu0  ;;  %v2580_v13 = vpop.f32.mrb[42].mxu1 }
 0x207   :  { %v2701_v40 = vpop.f32.mrb[77].mxu0  ;;  %v2581_v38 = vpop.f32.mrb[43].mxu1 }
 0x208   :  { %v4996_v27 = vadd.f32 %v1250_v7, %v1151_v19  ;;  %v2702_v16 = vadd.f32 %v2701_v40, %v2700_v57  ;;  %v2582_v3 = vadd.f32 %v2581_v38, %v2580_v13 }
 0x20a   :  { %v1156_v56 = vadd.f32 %v2582_v3, %v2529_v35  ;;  %v2703_v60 = vpop.f32.mrb[78].mxu0  ;;  %v2583_v17 = vpop.f32.mrb[44].mxu1 }
 0x20b   :  { %v2704_v45 = vpop.f32.mrb[79].mxu0  ;;  %v2584_v1 = vpop.f32.mrb[45].mxu1 }
 0x20c   :  { %v4998_v22 = vadd.f32 %v1255_v32, %v1156_v56  ;;  %v2705_v8 = vadd.f32 %v2704_v45, %v2703_v60  ;;  %v2585_v37 = vadd.f32 %v2584_v1, %v2583_v17 }
 0x20e   :  { %v1161_v30 = vadd.f32 %v2585_v37, %v2532_v28  ;;  %v2706_v0 = vpop.f32.mrb[80].mxu0  ;;  %v2586_v33 = vpop.f32.mrb[46].mxu1 }
 0x20f   :  { %v2707_v31 = vpop.f32.mrb[81].mxu0  ;;  %v2587_v34 = vpop.f32.mrb[47].mxu1 }
 0x210   :  { %v5000_v12 = vadd.f32 %v1260_v36, %v1161_v30  ;;  %v2708_v46 = vadd.f32 %v2707_v31, %v2706_v0  ;;  %v2588_v6 = vadd.f32 %v2587_v34, %v2586_v33 }
 0x212   :  { %v1166_v18 = vadd.f32 %v2588_v6, %v2535_v48  ;;  %v2709_v41 = vpop.f32.mrb[82].mxu0  ;;  %v2589_v35 = vpop.f32.mrb[48].mxu1 }
 0x213   :  { %v2710_v24 = vpop.f32.mrb[83].mxu0  ;;  %v2590_v49 = vpop.f32.mrb[49].mxu1 }
 0x214   :  { %v5002_v39 = vadd.f32 %v1265_v42, %v1166_v18  ;;  %v2711_v10 = vadd.f32 %v2710_v24, %v2709_v41  ;;  %v2591_v20 = vadd.f32 %v2590_v49, %v2589_v35 }
 0x216   :  { %v1171_v23 = vadd.f32 %v2591_v20, %v4986_v52  ;;  %v2712_v28 = vpop.f32.mrb[84].mxu0 }
 0x217   :  { %v2713_v26 = vpop.f32.mrb[85].mxu0 }
 0x218   :  { %v5005_v29 = vadd.f32 %v1270_v50, %v1171_v23  ;;  %v2714_v7 = vadd.f32 %v2713_v26, %v2712_v28 }
 0x21a   :  { %v2647_v43 = vpop.f32.mrb[50].mxu1  ;;  %v2715_v47 = vpop.f32.mrb[86].mxu0 }
 0x21b   :  { %v2648_v32 = vpop.f32.mrb[51].mxu1  ;;  %v2716_v55 = vpop.f32.mrb[87].mxu0 }
 0x21c   :  { %v2649_v48 = vadd.f32 %v2648_v32, %v2647_v43  ;;  %v2717_v36 = vadd.f32 %v2716_v55, %v2715_v47 }
 0x21e   :  { %v2650_v58 = vpop.f32.mrb[52].mxu1  ;;  %v2718_v15 = vpop.f32.mrb[88].mxu0  ;;  %v1476_v53 = vadd.f32 %v2702_v16, %v2649_v48 }
 0x21f   :  { %v2651_v42 = vpop.f32.mrb[53].mxu1  ;;  %v2719_v62 = vpop.f32.mrb[89].mxu0 }
 0x220   :  { %v2652_v21 = vadd.f32 %v2651_v42, %v2650_v58  ;;  %v2720_v61 = vadd.f32 %v2719_v62, %v2718_v15 }
 0x222   :  { %v2653_v54 = vpop.f32.mrb[54].mxu1  ;;  %v1481_v52 = vadd.f32 %v2705_v8, %v2652_v21 }
 0x223   :  { %v2654_v25 = vpop.f32.mrb[55].mxu1 }
 0x224   :  { %v2655_v59 = vadd.f32 %v2654_v25, %v2653_v54 }
 0x226   :  { %v2656_v50 = vpop.f32.mrb[56].mxu1  ;;  %v1486_v11 = vadd.f32 %v2708_v46, %v2655_v59 }
 0x227   :  { %v2776_v5 = vpop.f32.mrb[90].mxu0  ;;  %v2657_v44 = vpop.f32.mrb[57].mxu1 }
 0x228   :  { %v2658_v9 = vadd.f32 %v2657_v44, %v2656_v50  ;;  %v2777_v14 = vpop.f32.mrb[91].mxu0 }
 0x229   :  { %v5007_v19 = vadd.f32 %v2777_v14, %v2776_v5 }
 0x22a   :  { %v2659_v57 = vpop.f32.mrb[58].mxu1  ;;  %v1491_v13 = vadd.f32 %v2711_v10, %v2658_v9 }
 0x22b   :  { %v2779_v40 = vpop.f32.mrb[92].mxu0  ;;  %v2660_v38 = vpop.f32.mrb[59].mxu1 }
 0x22c   :  { %v2661_v16 = vadd.f32 %v2660_v38, %v2659_v57  ;;  %v2780_v3 = vpop.f32.mrb[93].mxu0 }
 0x22d   :  { %v5009_v56 = vadd.f32 %v2780_v3, %v2779_v40 }
 0x22e   :  { %v2662_v60 = vpop.f32.mrb[60].mxu1  ;;  %v1496_v17 = vadd.f32 %v2714_v7, %v2661_v16 }
 0x22f   :  { %v2782_v45 = vpop.f32.mrb[94].mxu0  ;;  %v2663_v1 = vpop.f32.mrb[61].mxu1 }
 0x230   :  { %v2664_v8 = vadd.f32 %v2663_v1, %v2662_v60  ;;  %v2783_v37 = vpop.f32.mrb[95].mxu0 }
 0x231   :  { %v5011_v30 = vadd.f32 %v2783_v37, %v2782_v45 }
 0x232   :  { %v2665_v0 = vpop.f32.mrb[62].mxu1  ;;  %v1501_v33 = vadd.f32 %v2717_v36, %v2664_v8 }
 0x233   :  { %v2785_v31 = vpop.f32.mrb[96].mxu0  ;;  %v2666_v34 = vpop.f32.mrb[63].mxu1 }
 0x234   :  { %v2667_v46 = vadd.f32 %v2666_v34, %v2665_v0  ;;  %v2786_v6 = vpop.f32.mrb[97].mxu0 }
 0x235   :  { %v5013_v18 = vadd.f32 %v2786_v6, %v2785_v31 }
 0x236   :  { %v1506_v41 = vadd.f32 %v2720_v61, %v2667_v46 }
 0x237   :  { %v2788_v35 = vpop.f32.mrb[98].mxu0 }
 0x238   :  { %v2789_v24 = vpop.f32.mrb[99].mxu0 }
 0x239   :  { %v5015_v49 = vadd.f32 %v2789_v24, %v2788_v35 }
 0x23b   :  { %v1575_v10 = vpop.f32.mrb[64].mxu1  ;;  %v2791_v20 = vpop.f32.mrb[100].mxu0 }
 0x23c   :  { %v1576_v23 = vadd.f32 %v1575_v10, %v1476_v53  ;;  %v3058_v28 = vpop.f32.mrb[65].mxu1  ;;  %v2792_v26 = vpop.f32.mrb[101].mxu0 }
 0x23d   :  { %v5017_v7 = vadd.f32 %v2792_v26, %v2791_v20 }
 0x23e   :  { %v1944_v34 = vmax.f32 %v1576_v23, 1e-24 }
 0x23f   :  { %v1580_v43 = vpop.f32.mrb[66].mxu1  ;;  %v2794_v47 = vpop.f32.mrb[102].mxu0 }
 0x240   :  { %v1581_v32 = vadd.f32 %v1580_v43, %v1481_v52  ;;  %v3061_v55 = vpop.f32.mrb[67].mxu1  ;;  %v2795_v48 = vpop.f32.mrb[103].mxu0  ;;  %3592 = vrsqrt.f32 %v1944_v34 }
 0x241   :  { %v5019_v36 = vadd.f32 %v2795_v48, %v2794_v47 }
 0x242   :  { %v1945_v26 = vmax.f32 %v1581_v32, 1e-24 }
 0x243   :  { %v1585_v58 = vpop.f32.mrb[68].mxu1 }
 0x244   :  { %v1586_v15 = vadd.f32 %v1585_v58, %v1486_v11  ;;  %v3064_v42 = vpop.f32.mrb[69].mxu1 }
 0x246   :  { %v1946_v58 = vmax.f32 %v1586_v15, 1e-24 }
 0x247   :  { %v1590_v62 = vpop.f32.mrb[70].mxu1 }
 0x248   :  { %v5021_v21 = vadd.f32 %v1590_v62, %v1491_v13  ;;  %v1910_v61 = vpop.f32.mrb[104].mxu0  ;;  %v3067_v54 = vpop.f32.mrb[71].mxu1 }
 0x249   :  { %v3111_v53 = vpop.f32.mrb[105].mxu0 }
 0x24a   :  { %v1947_v32 = vmax.f32 %v5021_v21, 1e-24 }
 0x24b   :  { %v1595_v25 = vpop.f32.mrb[72].mxu1 }
 0x24c   :  { %v5023_v59 = vadd.f32 %v1595_v25, %v1496_v17  ;;  %v1915_v50 = vpop.f32.mrb[106].mxu0  ;;  %v3070_v5 = vpop.f32.mrb[73].mxu1 }
 0x24d   :  { %v3114_v44 = vpop.f32.mrb[107].mxu0 }
 0x24e   :  { %v3593_v44 = vpop.eup %3592 }
 0x24f   :  { %v1600_v52 = vpop.f32.mrb[74].mxu1 }
 0x250   :  { %v5025_v9 = vadd.f32 %v1600_v52, %v1501_v33  ;;  %v1920_v14 = vpop.f32.mrb[108].mxu0  ;;  %v3073_v57 = vpop.f32.mrb[75].mxu1 }
 0x251   :  { %v3117_v40 = vpop.f32.mrb[109].mxu0 }
 0x253   :  { %v1605_v11 = vpop.f32.mrb[76].mxu1 }
 0x254   :  { %v5027_v38 = vadd.f32 %v1605_v11, %v1506_v41  ;;  %v1925_v13 = vpop.f32.mrb[110].mxu0  ;;  %v3076_v16 = vpop.f32.mrb[77].mxu1 }
 0x255   :  { %v3120_v3 = vpop.f32.mrb[111].mxu0 }
 0x258   :  { %v1930_v60 = vpop.f32.mrb[112].mxu0 }
 0x259   :  { %v3123_v45 = vpop.f32.mrb[113].mxu0 }
 0x25b   :  { %v2829_v1 = vpop.f32.mrb[78].mxu1 }
 0x25c   :  { %v5029_v17 = vpop.f32.mrb[114].mxu0  ;;  %v2830_v8 = vpop.f32.mrb[79].mxu1 }
 0x25d   :  { %v2831_v37 = vadd.f32 %v2830_v8, %v2829_v1  ;;  %v3126_v0 = vpop.f32.mrb[115].mxu0 }
 0x25f   :  { %v1811_v33 = vadd.f32 %v2831_v37, %v5007_v19  ;;  %v2832_v31 = vpop.f32.mrb[80].mxu1 }
 0x260   :  { %v5032_v46 = vpop.f32.mrb[116].mxu0  ;;  %v2833_v6 = vpop.f32.mrb[81].mxu1 }
 0x261   :  { %v1911_v41 = vadd.f32 %v1910_v61, %v1811_v33  ;;  %v2834_v35 = vadd.f32 %v2833_v6, %v2832_v31  ;;  %v3129_v24 = vpop.f32.mrb[117].mxu0 }
 0x263   :  { %v1958_v10 = vmax.f32 %v1911_v41, 1e-24  ;;  %v1816_v20 = vadd.f32 %v2834_v35, %v5009_v56  ;;  %v2835_v28 = vpop.f32.mrb[82].mxu1 }
 0x264   :  { %v2836_v43 = vpop.f32.mrb[83].mxu1 }
 0x265   :  { %3594 = vrsqrt.f32 %v1958_v10  ;;  %v1916_v47 = vadd.f32 %v1915_v50, %v1816_v20  ;;  %v2837_v55 = vadd.f32 %v2836_v43, %v2835_v28 }
 0x266   :  { %3596 = vrsqrt.f32 %v1945_v26 }
 0x267   :  { %v1959_v48 = vmax.f32 %v1916_v47, 1e-24  ;;  %v1821_v19 = vadd.f32 %v2837_v55, %v5011_v30  ;;  %v2838_v23 = vpop.f32.mrb[84].mxu1 }
 0x268   :  { %v2839_v42 = vpop.f32.mrb[85].mxu1 }
 0x269   :  { %3598 = vrsqrt.f32 %v1959_v48  ;;  %v1921_v62 = vadd.f32 %v1920_v14, %v1821_v19  ;;  %v2840_v61 = vadd.f32 %v2839_v42, %v2838_v23  ;;  %v1948_v14 = vmax.f32 %v5023_v59, 1e-24  ;;  %v2204_v23 = vld [vmem:[%s5222_s8 + $0x10] sm:$0xff] }
 0x26a   :  { %3600 = vrsqrt.f32 %v1946_v58 }
 0x26b   :  { %v1960_v54 = vmax.f32 %v1921_v62, 1e-24  ;;  %v1826_v56 = vadd.f32 %v2840_v61, %v5013_v18  ;;  %v2841_v53 = vpop.f32.mrb[86].mxu1  ;;  %v2206_v62 = vld [vmem:[%s5222_s8 + $0x20] sm:$0xff]  ;;  %v2207_v61 = vld [vmem:[%s5222_s8 + $0x28] sm:$0xff] }
 0x26c   :  { %v2842_v25 = vpop.f32.mrb[87].mxu1 }
 0x26d   :  { %3602 = vrsqrt.f32 %v1960_v54  ;;  %v1926_v50 = vadd.f32 %v1925_v13, %v1826_v56  ;;  %v2843_v5 = vadd.f32 %v2842_v25, %v2841_v53  ;;  %v3548_v54 = vpack.c.bf16 %v2207_v61, %v2206_v62  ;;  %v2208_v56 = vld [vmem:[%s5222_s8 + $0x30] sm:$0xff]  ;;  %v2209_v53 = vld [vmem:[%s5222_s8 + $0x38] sm:$0xff]  ;;  %v2210_v25 = vld [vmem:[%s5222_s8 + $0x40] sm:$0xff] }
 0x26e   :  { %3604 = vrsqrt.f32 %v1947_v32  ;;  %v3551_v32 = vpack.c.bf16 %v2209_v53, %v2208_v56  ;;  %v2309_v62 = vld [vmem:[%s5225_s10 + $0x58] sm:$0xff]  ;;  %v2311_v56 = vld [vmem:[%s5225_s10 + $0x68] sm:$0xff] }
 0x26f   :  { %v3595_v30 = vpop.eup %3594  ;;  %v1961_v52 = vmax.f32 %v1926_v50, 1e-24  ;;  %v1831_v15 = vadd.f32 %v2843_v5, %v5015_v49  ;;  %v2844_v57 = vpop.f32.mrb[88].mxu1  ;;  %v1949_v49 = vmax.f32 %v5025_v9, 1e-24  ;;  %v2211_v50 = vld [vmem:[%s5222_s8 + $0x48] sm:$0xff] }
 0x270   :  { %v1972_v40 = vmul.f32 %v3595_v30, %v3593_v44  ;;  %v2845_v11 = vpop.f32.mrb[89].mxu1  ;;  %v3597_v21 = vpop.eup %3596  ;;  %v1950_v9 = vmax.f32 %v5027_v38, 1e-24  ;;  %v3554_v5 = vpack.c.bf16 %v2211_v50, %v2210_v25  ;;  %v2212_v44 = vld [vmem:[%s5222_s8 + $0x50] sm:$0xff]  ;;  %v2213_v30 = vld [vmem:[%s5222_s8 + $0x58] sm:$0xff] }
 0x271   :  { %3606 = vrsqrt.f32 %v1961_v52  ;;  %v1931_v18 = vadd.f32 %v1930_v60, %v1831_v15  ;;  %v2846_v16 = vadd.f32 %v2845_v11, %v2844_v57  ;;  %v3557_v52 = vpack.c.bf16 %v2213_v30, %v2212_v44  ;;  %v2214_v15 = vld [vmem:[%s5222_s8 + $0x60] sm:$0xff]  ;;  %v2215_v57 = vld [vmem:[%s5222_s8 + $0x68] sm:$0xff]  ;;  %v2312_v50 = vld [vmem:[%s5225_s10 + $0x70] sm:$0xff] }
 0x272   :  { %v1979_v3 = vmul.f32 %v1972_v40, %v4992_v63  ;;  %3608 = vrsqrt.f32 %v1948_v14  ;;  %v3560_v14 = vpack.c.bf16 %v2215_v57, %v2214_v15  ;;  %v17_v30 = vstv %s5226_s11 }
 0x273   :  { %v3599_v13 = vpop.eup %3598  ;;  %v1962_v45 = vmax.f32 %v1931_v18, 1e-24  ;;  %v1836_v1 = vadd.f32 %v2846_v16, %v5017_v7  ;;  %v2847_v8 = vpop.f32.mrb[90].mxu1  ;;  %v2113_v18 = vld [vmem:[%s5223_s6] sm:$0xff]  ;;  %v2114_v16 = vld [vmem:[%s5223_s6 + $0x8] sm:$0xff] }
 0x274   :  { %v2848_v37 = vpop.f32.mrb[91].mxu1  ;;  %3133 = vmatmul.mubr.msk.f32.vlgmr.msra.gmra.mrb[92].mxu1 %vm1987_vm6, %v1979_v3  ;;  %v1973_v59 = vmul.f32 %v3599_v13, %v3597_v21  ;;  %v3601_v63 = vpop.eup %3600  ;;  %18 = vst [vmem:[#allocation2] sm:$0x1] %v17_v30 }
 0x275   :  { %3610 = vrsqrt.f32 %v1962_v45  ;;  %v1936_v60 = vadd.f32 %v5029_v17, %v1836_v1  ;;  %v2849_v0 = vadd.f32 %v2848_v37, %v2847_v8  ;;  %3135 = vmatprep.mubr.msk.f32.mxu1 %vm3627_vm4, %v5354_v4  ;;  %v2115_v37 = vld [vmem:[%s5223_s6 + $0x10] sm:$0xff] }
 0x276   :  { %v1980_v33 = vmul.f32 %v1973_v59, %v4994_v51  ;;  %3612 = vrsqrt.f32 %v1949_v49  ;;  %v2116_v59 = vld [vmem:[%s5223_s6 + $0x18] sm:$0xff] }
 0x277   :  { %v3603_v31 = vpop.eup %3602  ;;  %v1963_v7 = vmax.f32 %v1936_v60, 1e-24  ;;  %v1841_v34 = vadd.f32 %v2849_v0, %v5019_v36 }
 0x278   :  { %3136 = vmatmul.mubr.msk.f32.gmra.mrb[94].mxu1 %vm1987_vm6, %v1980_v33  ;;  %v1974_v6 = vmul.f32 %v3603_v31, %v3601_v63  ;;  %v3605_v41 = vpop.eup %3604 }
 0x279   :  { %3614 = vrsqrt.f32 %v1963_v7  ;;  %v1941_v17 = vadd.f32 %v5032_v46, %v1841_v34  ;;  %3138 = vmatprep.mubr.msk.f32.mxu1 %vm3627_vm4, %v5354_v4 }
 0x27a   :  { %v1981_v35 = vmul.f32 %v1974_v6, %v4996_v27  ;;  %3616 = vrsqrt.f32 %v1950_v9  ;;  %v2117_v9 = vld [vmem:[%s5223_s6 + $0x20] sm:$0xff]  ;;  %v2118_v6 = vld [vmem:[%s5223_s6 + $0x28] sm:$0xff] }
 0x27b   :  { %v3607_v51 = vpop.eup %3606  ;;  %v1964_v24 = vmax.f32 %v1941_v17, 1e-24 }
 0x27c   :  { %3139 = vmatmul.mubr.msk.f32.gmra.mrb[96].mxu1 %vm1987_vm6, %v1981_v35  ;;  %v1975_v36 = vmul.f32 %v3607_v51, %v3605_v41  ;;  %v3609_v38 = vpop.eup %3608 }
 0x27d   :  { %3618 = vrsqrt.f32 %v1964_v24  ;;  %3141 = vmatprep.mubr.msk.f32.mxu1 %vm3627_vm4, %v5354_v4 }
 0x27e   :  { %v1982_v10 = vmul.f32 %v1975_v36, %v4998_v22 }
 0x27f   :  { %v3611_v46 = vpop.eup %3610 }
 0x280   :  { %3142 = vmatmul.mubr.msk.f32.gmra.mrb[98].mxu1 %vm1987_vm6, %v1982_v10  ;;  %v1976_v20 = vmul.f32 %v3611_v46, %v3609_v38  ;;  %v3613_v27 = vpop.eup %3612  ;;  %v2119_v38 = vld [vmem:[%s5223_s6 + $0x30] sm:$0xff] }
 0x281   :  { %3144 = vmatprep.mubr.msk.f32.mxu1 %vm3627_vm4, %v5354_v4 }
 0x282   :  { %v1983_v28 = vmul.f32 %v1976_v20, %v5000_v12  ;;  %v2202_v12 = vld [vmem:[%s5222_s8] sm:$0xff] }
 0x283   :  { %v3615_v26 = vpop.eup %3614  ;;  %v2127_v20 = vld [vmem:[%s5224_s7] sm:$0x3] }
 0x284   :  { %3145 = vmatmul.mubr.msk.f32.gmra.mrb[100].mxu1 %vm1987_vm6, %v1983_v28  ;;  %v1977_v43 = vmul.f32 %v3615_v26, %v3613_v27  ;;  %v3617_v47 = vpop.eup %3616  ;;  %v2298_v27 = vld [vmem:[%s5225_s10] sm:$0xff]  ;;  %v2299_v28 = vld [vmem:[%s5225_s10 + $0x8] sm:$0xff]  ;;  %v2300_v26 = vld [vmem:[%s5225_s10 + $0x10] sm:$0xff] }
 0x285   :  { %3147 = vmatprep.mubr.msk.f32.mxu1 %vm3627_vm4, %v5354_v4 }
 0x286   :  { %v1984_v22 = vmul.f32 %v1977_v43, %v5002_v39  ;;  %v2203_v39 = vld [vmem:[%s5222_s8 + $0x8] sm:$0xff]  ;;  %v3563_v43 = vpack.c.bf16 %v2299_v28, %v2298_v27 }
 0x287   :  { %v3619_v55 = vpop.eup %3618  ;;  %v3542_v58 = vpack.c.bf16 %v2203_v39, %v2202_v12  ;;  %v2305_v12 = vld [vmem:[%s5225_s10 + $0x38] sm:$0xff] }
 0x288   :  { %3148 = vmatmul.mubr.msk.f32.gmra.mrb[102].mxu1 %vm1987_vm6, %v1984_v22  ;;  %v1978_v48 = vmul.f32 %v3619_v55, %v3617_v47  ;;  %v2301_v47 = vld [vmem:[%s5225_s10 + $0x18] sm:$0xff]  ;;  %v2303_v55 = vld [vmem:[%s5225_s10 + $0x28] sm:$0xff] }
 0x289   :  { %3150 = vmatprep.mubr.msk.f32.mxu1 %vm3627_vm4, %v5354_v4  ;;  %3543 = vmatpush3.bf16.msra.mxu0 %v3542_v58  ;;  %v3566_v22 = vpack.c.bf16 %v2301_v47, %v2300_v26  ;;  %v2307_v58 = vld [vmem:[%s5225_s10 + $0x48] sm:$0xff] }
 0x28a   :  { %v1985_v19 = vmul.f32 %v1978_v48, %v5005_v29  ;;  %v2205_v29 = vld [vmem:[%s5222_s8 + $0x18] sm:$0xff]  ;;  %3544 = vmatprep.subr.bf16.mxu0 %v5333_v2 }
 0x28b   :  { %v3545_v42 = vpack.c.bf16 %v2205_v29, %v2204_v23  ;;  %v2306_v23 = vld [vmem:[%s5225_s10 + $0x40] sm:$0xff] }
 0x28c   :  { %3151 = vmatmul.mubr.msk.f32.gmra.mrb[104].mxu1 %vm1987_vm6, %v1985_v19  ;;  %v2304_v19 = vld [vmem:[%s5225_s10 + $0x30] sm:$0xff]  ;;  %v3575_v29 = vpack.c.bf16 %v2307_v58, %v2306_v23 }
 0x28d   :  { %3167 = vmatprep.mubr.msk.f32.mxu1 %vm3627_vm4, %v5354_v4  ;;  %3546 = vmatpush3.bf16.msra.mxu0 %v3545_v42  ;;  %v3572_v39 = vpack.c.bf16 %v2305_v12, %v2304_v19  ;;  %v2308_v42 = vld [vmem:[%s5225_s10 + $0x50] sm:$0xff] }
 0x28e   :  { %3547 = vmatprep.subr.bf16.mxu0 %v5333_v2  ;;  %v3578_v61 = vpack.c.bf16 %v2309_v62, %v2308_v42 }
 0x291   :  { %3549 = vmatpush3.bf16.msra.mxu0 %v3548_v54  ;;  %v2310_v54 = vld [vmem:[%s5225_s10 + $0x60] sm:$0xff] }
 0x292   :  { %3550 = vmatprep.subr.bf16.mxu0 %v5333_v2  ;;  %v3581_v53 = vpack.c.bf16 %v2311_v56, %v2310_v54 }
 0x295   :  { %3552 = vmatpush3.bf16.msra.mxu0 %v3551_v32 }
 0x296   :  { %3553 = vmatprep.subr.bf16.mxu0 %v5333_v2 }
 0x299   :  { %3555 = vmatpush3.bf16.msra.mxu0 %v3554_v5  ;;  %v2313_v5 = vld [vmem:[%s5225_s10 + $0x78] sm:$0xff] }
 0x29a   :  { %3556 = vmatprep.subr.bf16.mxu0 %v5333_v2  ;;  %v3584_v44 = vpack.c.bf16 %v2313_v5, %v2312_v50 }
 0x29d   :  { %3558 = vmatpush3.bf16.msra.mxu0 %v3557_v52 }
 0x29e   :  { %3559 = vmatprep.subr.bf16.mxu0 %v5333_v2 }
 0x2a1   :  { %3561 = vmatpush3.bf16.msra.mxu0 %v3560_v14 }
 0x347   :  { %v2079_v40 = vpop.f32.mrb[92].mxu1 }
 0x348   :  { %v3134_v11 = vpop.f32.mrb[93].mxu1  ;;  %v2120_v3 = vmul.f32 %v2113_v18, %v2079_v40  ;;  %v2466_v40 = vld [vmem:[#allocation2] ss:$0 sm:$0xff] }
 0x34b   :  { %v2084_v21 = vpop.f32.mrb[94].mxu1 }
 0x34c   :  { %v2121_v13 = vmul.f32 %v2114_v16, %v2084_v21  ;;  %v3137_v45 = vpop.f32.mrb[95].mxu1 }
 0x34e   :  { %v3533_v1 = vpack.c.bf16 %v2121_v13, %v2120_v3 }
 0x34f   :  { %v2089_v8 = vpop.f32.mrb[96].mxu1 }
 0x350   :  { %v3140_v49 = vpop.f32.mrb[97].mxu1  ;;  %3534 = vmatpush3.bf16.msra.mxu1 %v3533_v1  ;;  %v2122_v0 = vmul.f32 %v2115_v37, %v2089_v8 }
 0x351   :  { %3535 = vmatprep.subr.bf16.mxu1 %v5333_v2 }
 0x353   :  { %v2094_v60 = vpop.f32.mrb[98].mxu1 }
 0x354   :  { %v2123_v63 = vmul.f32 %v2116_v59, %v2094_v60  ;;  %v3143_v33 = vpop.f32.mrb[99].mxu1 }
 0x356   :  { %v3536_v31 = vpack.c.bf16 %v2123_v63, %v2122_v0 }
 0x357   :  { %v2099_v7 = vpop.f32.mrb[100].mxu1 }
 0x358   :  { %v3146_v34 = vpop.f32.mrb[101].mxu1  ;;  %3537 = vmatpush3.bf16.msra.mxu1 %v3536_v31  ;;  %v2124_v41 = vmul.f32 %v2117_v9, %v2099_v7 }
 0x359   :  { %3538 = vmatprep.subr.bf16.mxu1 %v5333_v2 }
 0x35b   :  { %v2104_v17 = vpop.f32.mrb[102].mxu1 }
 0x35c   :  { %v2125_v35 = vmul.f32 %v2118_v6, %v2104_v17  ;;  %v3149_v51 = vpop.f32.mrb[103].mxu1 }
 0x35e   :  { %v3539_v24 = vpack.c.bf16 %v2125_v35, %v2124_v41 }
 0x35f   :  { %v2109_v36 = vpop.f32.mrb[104].mxu1 }
 0x360   :  { %v3152_v10 = vpop.f32.mrb[105].mxu1  ;;  %3540 = vmatpush3.bf16.msra.mxu1 %v3539_v24  ;;  %v2126_v46 = vmul.f32 %v2119_v38, %v2109_v36 }
 0x361   :  { %3165 = vmatprep.subr.mxu1 %v5354_v4 }
 0x364   :  { %3166 = vmatpush3.msra.mxu1 %v2126_v46 }
 0x365   :  { %3168 = vmatmul.mubr.msk.f32.vlgmr.msra.gmra.mrb[106].mxu1 %vm2128_vm7, %v2127_v20  ;;  %3562 = vmatprep.subr.bf16.mxu1 %v5333_v2 }
 0x366   :  { %3233 = vmatprep.mubr.msk.f32.mxu1 %vm3627_vm4, %v5354_v4  ;;  %3564 = vmatpush3.bf16.msra.mxu1 %v3563_v43  ;;  %v2302_v4 = vld [vmem:[%s5225_s10 + $0x20] sm:$0xff] }
 0x367   :  { %3565 = vmatprep.subr.bf16.mxu1 %v5333_v2  ;;  %v3569_v48 = vpack.c.bf16 %v2303_v55, %v2302_v4 }
 0x36a   :  { %3567 = vmatpush3.bf16.msra.mxu1 %v3566_v22 }
 0x36b   :  { %3568 = vmatprep.subr.bf16.mxu1 %v5333_v2 }
 0x36e   :  { %3570 = vmatpush3.bf16.msra.mxu1 %v3569_v48 }
 0x36f   :  { %3571 = vmatprep.subr.bf16.mxu1 %v5333_v2 }
 0x372   :  { %3573 = vmatpush3.bf16.msra.mxu1 %v3572_v39 }
 0x373   :  { %3574 = vmatprep.subr.bf16.mxu1 %v5333_v2 }
 0x376   :  { %3576 = vmatpush3.bf16.msra.mxu1 %v3575_v29 }
 0x377   :  { %3577 = vmatprep.subr.bf16.mxu1 %v5333_v2 }
 0x37a   :  { %3579 = vmatpush3.bf16.msra.mxu1 %v3578_v61 }
 0x37b   :  { %3580 = vmatprep.subr.bf16.mxu1 %v5333_v2 }
 0x37e   :  { %3582 = vmatpush3.bf16.msra.mxu1 %v3581_v53 }
 0x37f   :  { %3583 = vmatprep.subr.bf16.mxu1 %v5333_v2  ;;  %v2464_v2 = vld [vmem:[%s5227_s9] ss:$0 sm:$0xff] }
 0x382   :  { %3585 = vmatpush3.bf16.msra.mxu1 %v3584_v44 }
 0x438   :  { %v2198_v32 = vpop.f32.mrb[106].mxu1 }
 0x439   :  { %v3169_v25 = vpop.f32.mrb[107].mxu1  ;;  %3199 = vmatmul.mubr.msk.f32.vlgmr.msra.gmra.mrb[118].mxu0 %vm2223_vm8, %v2198_v32 }
 0x50c   :  { %v2293_v52 = vpop.f32.mrb[118].mxu0 }
 0x50d   :  { %v2294_v15 = vadd.f32 %v2464_v2, %v2293_v52  ;;  %v3200_v57 = vpop.f32.mrb[119].mxu0 }
 0x50f   :  { %v2297_v14 = vmax.f32 %v2294_v15, 0.0 }
 0x511   :  { %3234 = vmatmul.mubr.f32.vlgmr.msra.gmra.mrb[108].mxu1 %v2297_v14 }
 0x5e4   :  { %v2387_v11 = vpop.f32.mrb[108].mxu1 }
 0x5e5   :  { %v2388_v18 = vadd.f32 %v2466_v40, %v2387_v11  ;;  %v3235_v16 = vpop.f32.mrb[109].mxu1 }
 0x5e7   :  { %v2467_v21 = vmul.f32 -1.442695, %v2388_v18 }
 0x5e9   :  { %3620 = vpow2.f32 %v2467_v21 }
 0x5f3   :  { %v3621_v3 = vpop.eup %3620 }
 0x5f4   :  { %v2394_v13 = vadd.f32 1.0, %v3621_v3 }
 0x5f6   :  { %3622 = vrcp.f32 %v2394_v13 }
 0x600   :  { %v3623_v45 = vpop.eup %3622 }
 0x601   :  { %2398 = vst.msk [vmem:[%s5228_s12] sm:$0x3] %vm2397_vm9, %v3623_v45 }

</bundles_post_ra>
